<compile_context>
chip_gen: v7x
topology: tpu7x:2x2x1
jax: 0.10.0
libtpu: 0.0.40
codegen_flags: <defaults>
</compile_context>

<pallas_src>
import jax
import jax.numpy as jnp
from jax import lax
from jax.experimental import pallas as pl
from jax.experimental.pallas import tpu as pltpu

NEG_SLOPE = 0.01  # nn.LeakyReLU(negative_slope=0.01)


# ------------------------------ Pallas kernel ------------------------------ #

def _down_conv_kernel(ph_ref, w4_ref, b4_ref, w1_ref, b1_ref, w2_ref, b2_ref,
                      wr_ref, br_ref, out_ref, pad_ref):
    """Fused down_conv for one batch image (all intermediates stay in VMEM).

    ph_ref : (4, Ho+1, Wo+1, Ci) bf16  -- stride-2 phase split of the padded input
             ph[2*pi+pj, a, b, c] == x_pad[c, 2a+pi, 2b+pj]
    w4_ref : (16, Ci, Co) bf16   taps of the 4x4 down conv (t = ki*4 + kj)
    w1_ref, w2_ref : (9, Co, Co) bf16   taps of the 3x3 convs (t = ki*3 + kj)
    wr_ref : (Co, Co) bf16       1x1 residual conv
    b*_ref : (1, Co) f32         biases
    out_ref: (1, Ho, Wo, Co) f32
    pad_ref: (Ho+2, Wo+2, Co) f32 scratch, reused for both 3x3 convs
    """
    _, Ho, Wo, Co = out_ref.shape
    Ci = ph_ref.shape[-1]
    M = Ho * Wo

    # ---- down: Conv2d(Ci, Co, k=4, s=2, p=1) -- im2col fused in VMEM ----
    acc = jnp.zeros((M, Co), jnp.float32)
    for p_i in range(2):
        for p_j in range(2):
            # slice/reshape in f32 (robust layout path), cast to bf16 at the MXU
            phase = ph_ref[2 * p_i + p_j].astype(jnp.float32)   # (Ho+1, Wo+1, Ci)
            for di in range(2):
                for dj in range(2):
                    ki, kj = 2 * di + p_i, 2 * dj + p_j         # 4x4 tap indices
                    tap = phase[di:di + Ho, dj:dj + Wo, :]
                    tap = tap.reshape(M, Ci).astype(jnp.bfloat16)
                    acc = acc + jnp.dot(tap, w4_ref[4 * ki + kj],
                                        preferred_element_type=jnp.float32)
    d = acc + b4_ref[...]                                       # (M, Co) float32

    # ---- conv_block residual branch: Conv2d(Co, Co, k=1) (fused, d in VMEM) ----
    r = jnp.dot(d.astype(jnp.bfloat16), wr_ref[...],
                preferred_element_type=jnp.float32) + br_ref[...]

    # ---- shared zero-padded scratch: memset once; the border stays zero for
    #      both 3x3 convs, only the interior is rewritten between them. ----
    pad_ref[...] = jnp.zeros_like(pad_ref)

    # ---- conv_block main branch, conv1: 3x3 / p=1 + LeakyReLU ----
    pad_ref[1:Ho + 1, 1:Wo + 1, :] = d.reshape(Ho, Wo, Co)
    acc1 = jnp.zeros((M, Co), jnp.float32)
    for ki in range(3):
        for kj in range(3):
            tap = pad_ref[ki:ki + Ho, kj:kj + Wo, :]            # window load from VMEM
            tap = tap.reshape(M, Co).astype(jnp.bfloat16)
            acc1 = acc1 + jnp.dot(tap, w1_ref[3 * ki + kj],
                                  preferred_element_type=jnp.float32)
    y1 = acc1 + b1_ref[...]
    y1 = jnp.where(y1 > 0, y1, NEG_SLOPE * y1)

    # ---- conv2: 3x3 / p=1 + LeakyReLU, then add the residual ----
    pad_ref[1:Ho + 1, 1:Wo + 1, :] = y1.reshape(Ho, Wo, Co)     # reuse same buffer
    acc2 = jnp.zeros((M, Co), jnp.float32)
    for ki in range(3):
        for kj in range(3):
            tap = pad_ref[ki:ki + Ho, kj:kj + Wo, :]
            tap = tap.reshape(M, Co).astype(jnp.bfloat16)
            acc2 = acc2 + jnp.dot(tap, w2_ref[3 * ki + kj],
                                  preferred_element_type=jnp.float32)
    y2 = acc2 + b2_ref[...]
    y2 = jnp.where(y2 > 0, y2, NEG_SLOPE * y2)

    out_ref[...] = (y2 + r).reshape(1, Ho, Wo, Co).astype(out_ref.dtype)


# ------------------------------ JAX wrapper --------------------------------- #

def _tap_matrices(w_oihw):
    """(Cout, Cin, KH, KW) -> (KH*KW, Cin, Cout); tap index t = ki*KW + kj."""
    co, ci, kh, kw = w_oihw.shape
    return jnp.transpose(w_oihw, (2, 3, 1, 0)).reshape(kh * kw, ci, co)


def down_conv_forward(params, x_nchw):
    """down_conv.forward — input/output in NCHW like PyTorch."""
    N, Ci, H, W = x_nchw.shape
    Co = params["down_w"].shape[0]
    assert H % 2 == 0 and W % 2 == 0, "k=4/s=2/p=1 down-conv expects even H, W"
    Ho, Wo = H // 2, W // 2

    # Spatial pad + stride-2 phase split + NCHW->channels-last in one XLA gather.
    # ph[n*4 + 2*pi + pj, a, b, c] = x_pad[n, c, 2a+pi, 2b+pj]
    xp = jnp.pad(x_nchw, ((0, 0), (0, 0), (1, 1), (1, 1)))
    ph = xp.reshape(N, Ci, Ho + 1, 2, Wo + 1, 2)
    ph = jnp.transpose(ph, (0, 3, 5, 2, 4, 1))
    ph = ph.reshape(N * 4, Ho + 1, Wo + 1, Ci).astype(jnp.bfloat16)

    w4 = _tap_matrices(params["down_w"]).astype(jnp.bfloat16)        # (16, Ci, Co)
    w1 = _tap_matrices(params["c1_w"]).astype(jnp.bfloat16)          # (9, Co, Co)
    w2 = _tap_matrices(params["c2_w"]).astype(jnp.bfloat16)          # (9, Co, Co)
    wr = jnp.transpose(params["res_w"][:, :, 0, 0]).astype(jnp.bfloat16)  # (Co, Co)
    b4 = params["down_b"].reshape(1, Co).astype(jnp.float32)
    b1 = params["c1_b"].reshape(1, Co).astype(jnp.float32)
    b2 = params["c2_b"].reshape(1, Co).astype(jnp.float32)
    br = params["res_b"].reshape(1, Co).astype(jnp.float32)

    def full(shape):  # weight/bias blocks: full array, resident across the grid
        return pl.BlockSpec(shape, lambda n: (0,) * len(shape))

    out_nhwc = pl.pallas_call(
        _down_conv_kernel,
        out_shape=jax.ShapeDtypeStruct((N, Ho, Wo, Co), jnp.float32),
        grid_spec=pltpu.PrefetchScalarGridSpec(
            num_scalar_prefetch=0,
            grid=(N,),  # one image per grid step; shards across TCs on v7x
            in_specs=[
                pl.BlockSpec((4, Ho + 1, Wo + 1, Ci), lambda n: (n, 0, 0, 0)),
                full((16, Ci, Co)), full((1, Co)),
                full((9, Co, Co)), full((1, Co)),
                full((9, Co, Co)), full((1, Co)),
                full((Co, Co)), full((1, Co)),
            ],
            out_specs=pl.BlockSpec((1, Ho, Wo, Co), lambda n: (n, 0, 0, 0)),
            scratch_shapes=[
                pltpu.VMEM((Ho + 2, Wo + 2, Co), jnp.float32),  # shared padded buf
            ],
        ),
        compiler_params=pltpu.CompilerParams(
            dimension_semantics=("parallel",),
            vmem_limit_bytes=32 * 1024 * 1024,  # safe on v5e/v6e/v7x
        ),
    )(ph, w4, b4, w1, b1, w2, b2, wr, br)

    # TODO(synk): for large spatial extents, add a second grid axis over output
    # row blocks (with a 2-row halo on d / matching phase rows) so per-step
    # tiles stay within the 64 MiB v7x VMEM budget.
    return jnp.transpose(out_nhwc, (0, 3, 1, 2))  # channels-last -> NCHW


# ----------------------------- params & reference --------------------------- #

def init_params(key, in_ch, out_ch):
    ks = jax.random.split(key, 8)

    def conv_w(k, cout, cin, kh, kw):
        bound = 1.0 / jnp.sqrt(cin * kh * kw)
        return jax.random.uniform(k, (cout, cin, kh, kw), jnp.float32, -bound, bound)

    def conv_b(k, cout, fan_in):
        bound = 1.0 / jnp.sqrt(fan_in)
        return jax.random.uniform(k, (cout,), jnp.float32, -bound, bound)

    return {
        "down_w": conv_w(ks[0], out_ch, in_ch, 4, 4),
        "down_b": conv_b(ks[1], out_ch, in_ch * 16),
        "c1_w": conv_w(ks[2], out_ch, out_ch, 3, 3),
        "c1_b": conv_b(ks[3], out_ch, out_ch * 9),
        "c2_w": conv_w(ks[4], out_ch, out_ch, 3, 3),
        "c2_b": conv_b(ks[5], out_ch, out_ch * 9),
        "res_w": conv_w(ks[6], out_ch, out_ch, 1, 1),
        "res_b": conv_b(ks[7], out_ch, out_ch),
    }


def _ref_conv(x, w, b, stride, pad, in_dtype=None):
    if in_dtype is not None:
        x = x.astype(in_dtype)
        w = w.astype(in_dtype)
    y = lax.conv_general_dilated(
        x, w, (stride, stride), ((pad, pad), (pad, pad)),
        dimension_numbers=("NCHW", "OIHW", "NCHW"),
        preferred_element_type=jnp.float32)
    return y + b[None, :, None, None]


def ref_forward(params, x_nchw, in_dtype=None):
    """Plain-XLA reference. in_dtype=bfloat16 mimics the kernel's MXU quantization."""
    leaky = lambda t: jnp.where(t > 0, t, NEG_SLOPE * t)
    d = _ref_conv(x_nchw, params["down_w"], params["down_b"], 2, 1, in_dtype)
    y1 = leaky(_ref_conv(d, params["c1_w"], params["c1_b"], 1, 1, in_dtype))
    y2 = leaky(_ref_conv(y1, params["c2_w"], params["c2_b"], 1, 1, in_dtype))
    r = _ref_conv(d, params["res_w"], params["res_b"], 1, 0, in_dtype)
    return y2 + r


if __name__ == "__main__":
    key = jax.random.PRNGKey(0)
    k_x, k_p = jax.random.split(key)

    in_ch, out_ch = 4, 8
    x = jax.random.normal(k_x, (2, in_ch, 16, 16), dtype=jnp.float32)
    params = init_params(k_p, in_ch, out_ch)

    fwd = jax.jit(down_conv_forward)
    out = jax.block_until_ready(fwd(params, x))
    assert out.shape == (2, out_ch, 8, 8), out.shape

    # Tight check vs a reference with the same quantization points
    # (bf16 conv inputs/weights, f32 accumulation): only summation order differs.
    ref_bf16 = jax.block_until_ready(ref_forward(params, x, in_dtype=jnp.bfloat16))
    err_bf16 = float(jnp.max(jnp.abs(out - ref_bf16)))
    assert err_bf16 < 5e-3, f"mismatch vs bf16-matched reference: {err_bf16}"

    # Loose check vs full-f32 semantics (difference = bf16 MXU-input quantization).
    ref_f32 = jax.block_until_ready(ref_forward(params, x))
    err_f32 = float(jnp.max(jnp.abs(out - ref_f32)))
    assert err_f32 < 7.5e-2, f"mismatch vs f32 reference: {err_f32}"

    print("KERNEL_OK")
</pallas_src>

<mosaic_0001>
module attributes {stable_mosaic.version = 11 : i64} {
  func.func @_down_conv_kernel(%arg0: i32, %arg1: memref<4x9x9x4xbf16, #tpu.memory_space<vmem>>, %arg2: memref<16x4x8xbf16, #tpu.memory_space<vmem>>, %arg3: memref<1x8xf32, #tpu.memory_space<vmem>>, %arg4: memref<9x8x8xbf16, #tpu.memory_space<vmem>>, %arg5: memref<1x8xf32, #tpu.memory_space<vmem>>, %arg6: memref<9x8x8xbf16, #tpu.memory_space<vmem>>, %arg7: memref<1x8xf32, #tpu.memory_space<vmem>>, %arg8: memref<8x8xbf16, #tpu.memory_space<vmem>>, %arg9: memref<1x8xf32, #tpu.memory_space<vmem>>, %arg10: memref<1x8x8x8xf32, #tpu.memory_space<vmem>>, %arg11: memref<10x10x8xf32, #tpu.memory_space<vmem>>) attributes {dimension_semantics = [#tpu.dimension_semantics<parallel>], iteration_bounds = array<i64: 2>, scalar_prefetch = 0 : i64, scratch_operands = 1 : i64, tpu.core_type = #tpu.core_type<tc>, window_params = [{transform_indices = @transform_0, window_bounds = array<i64: 4, 9, 9, 4>}, {pipeline_mode = #tpu.pipeline_mode<synchronous>, transform_indices = @transform_1, window_bounds = array<i64: 16, 4, 8>}, {pipeline_mode = #tpu.pipeline_mode<synchronous>, transform_indices = @transform_2, window_bounds = array<i64: 1, 8>}, {pipeline_mode = #tpu.pipeline_mode<synchronous>, transform_indices = @transform_3, window_bounds = array<i64: 9, 8, 8>}, {pipeline_mode = #tpu.pipeline_mode<synchronous>, transform_indices = @transform_4, window_bounds = array<i64: 1, 8>}, {pipeline_mode = #tpu.pipeline_mode<synchronous>, transform_indices = @transform_5, window_bounds = array<i64: 9, 8, 8>}, {pipeline_mode = #tpu.pipeline_mode<synchronous>, transform_indices = @transform_6, window_bounds = array<i64: 1, 8>}, {pipeline_mode = #tpu.pipeline_mode<synchronous>, transform_indices = @transform_7, window_bounds = array<i64: 8, 8>}, {pipeline_mode = #tpu.pipeline_mode<synchronous>, transform_indices = @transform_8, window_bounds = array<i64: 1, 8>}, {transform_indices = @transform_9, window_bounds = array<i64: 1, 8, 8, 8>}]} {
    %cst = arith.constant 0.000000e+00 : f32
    %0 = vector.broadcast %cst : f32 to vector<64x8xf32>
    %c0 = arith.constant 0 : index
    %c0_0 = arith.constant 0 : index
    %c0_1 = arith.constant 0 : index
    %c0_2 = arith.constant 0 : index
    %1 = vector.load %arg1[%c0, %c0_0, %c0_1, %c0_2] : memref<4x9x9x4xbf16, #tpu.memory_space<vmem>>, vector<1x9x9x4xbf16>
    %2 = vector.shape_cast %1 : vector<1x9x9x4xbf16> to vector<9x9x4xbf16>
    %3 = arith.extf %2 : vector<9x9x4xbf16> to vector<9x9x4xf32>
    %4 = vector.extract_strided_slice %3 {offsets = [0, 0, 0], sizes = [8, 8, 4], strides = [1, 1, 1]} : vector<9x9x4xf32> to vector<8x8x4xf32>
    %5 = vector.shape_cast %4 : vector<8x8x4xf32> to vector<64x4xf32>
    %6 = arith.truncf %5 : vector<64x4xf32> to vector<64x4xbf16>
    %c0_3 = arith.constant 0 : index
    %c0_4 = arith.constant 0 : index
    %c0_5 = arith.constant 0 : index
    %7 = vector.load %arg2[%c0_3, %c0_4, %c0_5] : memref<16x4x8xbf16, #tpu.memory_space<vmem>>, vector<1x4x8xbf16>
    %8 = vector.shape_cast %7 : vector<1x4x8xbf16> to vector<4x8xbf16>
    %cst_6 = arith.constant dense<0.000000e+00> : vector<64x8xf32>
    %9 = tpu.matmul %6, %8, %cst_6 {dimension_numbers = #tpu.dot_dimension_numbers<[1], [0], [0], [1], [0, 0, 1, 1], [], []>} : vector<64x4xbf16>, vector<4x8xbf16>, vector<64x8xf32> -> vector<64x8xf32>
    %10 = arith.addf %0, %9 : vector<64x8xf32>
    %11 = vector.extract_strided_slice %3 {offsets = [0, 1, 0], sizes = [8, 8, 4], strides = [1, 1, 1]} : vector<9x9x4xf32> to vector<8x8x4xf32>
    %12 = vector.shape_cast %11 : vector<8x8x4xf32> to vector<64x4xf32>
    %13 = arith.truncf %12 : vector<64x4xf32> to vector<64x4xbf16>
    %c2 = arith.constant 2 : index
    %c0_7 = arith.constant 0 : index
    %c0_8 = arith.constant 0 : index
    %14 = vector.load %arg2[%c2, %c0_7, %c0_8] : memref<16x4x8xbf16, #tpu.memory_space<vmem>>, vector<1x4x8xbf16>
    %15 = vector.shape_cast %14 : vector<1x4x8xbf16> to vector<4x8xbf16>
    %cst_9 = arith.constant dense<0.000000e+00> : vector<64x8xf32>
    %16 = tpu.matmul %13, %15, %cst_9 {dimension_numbers = #tpu.dot_dimension_numbers<[1], [0], [0], [1], [0, 0, 1, 1], [], []>} : vector<64x4xbf16>, vector<4x8xbf16>, vector<64x8xf32> -> vector<64x8xf32>
    %17 = arith.addf %10, %16 : vector<64x8xf32>
    %18 = vector.extract_strided_slice %3 {offsets = [1, 0, 0], sizes = [8, 8, 4], strides = [1, 1, 1]} : vector<9x9x4xf32> to vector<8x8x4xf32>
    %19 = vector.shape_cast %18 : vector<8x8x4xf32> to vector<64x4xf32>
    %20 = arith.truncf %19 : vector<64x4xf32> to vector<64x4xbf16>
    %c8 = arith.constant 8 : index
    %c0_10 = arith.constant 0 : index
    %c0_11 = arith.constant 0 : index
    %21 = vector.load %arg2[%c8, %c0_10, %c0_11] : memref<16x4x8xbf16, #tpu.memory_space<vmem>>, vector<1x4x8xbf16>
    %22 = vector.shape_cast %21 : vector<1x4x8xbf16> to vector<4x8xbf16>
    %cst_12 = arith.constant dense<0.000000e+00> : vector<64x8xf32>
    %23 = tpu.matmul %20, %22, %cst_12 {dimension_numbers = #tpu.dot_dimension_numbers<[1], [0], [0], [1], [0, 0, 1, 1], [], []>} : vector<64x4xbf16>, vector<4x8xbf16>, vector<64x8xf32> -> vector<64x8xf32>
    %24 = arith.addf %17, %23 : vector<64x8xf32>
    %25 = vector.extract_strided_slice %3 {offsets = [1, 1, 0], sizes = [8, 8, 4], strides = [1, 1, 1]} : vector<9x9x4xf32> to vector<8x8x4xf32>
    %26 = vector.shape_cast %25 : vector<8x8x4xf32> to vector<64x4xf32>
    %27 = arith.truncf %26 : vector<64x4xf32> to vector<64x4xbf16>
    %c10 = arith.constant 10 : index
    %c0_13 = arith.constant 0 : index
    %c0_14 = arith.constant 0 : index
    %28 = vector.load %arg2[%c10, %c0_13, %c0_14] : memref<16x4x8xbf16, #tpu.memory_space<vmem>>, vector<1x4x8xbf16>
    %29 = vector.shape_cast %28 : vector<1x4x8xbf16> to vector<4x8xbf16>
    %cst_15 = arith.constant dense<0.000000e+00> : vector<64x8xf32>
    %30 = tpu.matmul %27, %29, %cst_15 {dimension_numbers = #tpu.dot_dimension_numbers<[1], [0], [0], [1], [0, 0, 1, 1], [], []>} : vector<64x4xbf16>, vector<4x8xbf16>, vector<64x8xf32> -> vector<64x8xf32>
    %31 = arith.addf %24, %30 : vector<64x8xf32>
    %c1 = arith.constant 1 : index
    %c0_16 = arith.constant 0 : index
    %c0_17 = arith.constant 0 : index
    %c0_18 = arith.constant 0 : index
    %32 = vector.load %arg1[%c1, %c0_16, %c0_17, %c0_18] : memref<4x9x9x4xbf16, #tpu.memory_space<vmem>>, vector<1x9x9x4xbf16>
    %33 = vector.shape_cast %32 : vector<1x9x9x4xbf16> to vector<9x9x4xbf16>
    %34 = arith.extf %33 : vector<9x9x4xbf16> to vector<9x9x4xf32>
    %35 = vector.extract_strided_slice %34 {offsets = [0, 0, 0], sizes = [8, 8, 4], strides = [1, 1, 1]} : vector<9x9x4xf32> to vector<8x8x4xf32>
    %36 = vector.shape_cast %35 : vector<8x8x4xf32> to vector<64x4xf32>
    %37 = arith.truncf %36 : vector<64x4xf32> to vector<64x4xbf16>
    %c1_19 = arith.constant 1 : index
    %c0_20 = arith.constant 0 : index
    %c0_21 = arith.constant 0 : index
    %38 = vector.load %arg2[%c1_19, %c0_20, %c0_21] : memref<16x4x8xbf16, #tpu.memory_space<vmem>>, vector<1x4x8xbf16>
    %39 = vector.shape_cast %38 : vector<1x4x8xbf16> to vector<4x8xbf16>
    %cst_22 = arith.constant dense<0.000000e+00> : vector<64x8xf32>
    %40 = tpu.matmul %37, %39, %cst_22 {dimension_numbers = #tpu.dot_dimension_numbers<[1], [0], [0], [1], [0, 0, 1, 1], [], []>} : vector<64x4xbf16>, vector<4x8xbf16>, vector<64x8xf32> -> vector<64x8xf32>
    %41 = arith.addf %31, %40 : vector<64x8xf32>
    %42 = vector.extract_strided_slice %34 {offsets = [0, 1, 0], sizes = [8, 8, 4], strides = [1, 1, 1]} : vector<9x9x4xf32> to vector<8x8x4xf32>
    %43 = vector.shape_cast %42 : vector<8x8x4xf32> to vector<64x4xf32>
    %44 = arith.truncf %43 : vector<64x4xf32> to vector<64x4xbf16>
    %c3 = arith.constant 3 : index
    %c0_23 = arith.constant 0 : index
    %c0_24 = arith.constant 0 : index
    %45 = vector.load %arg2[%c3, %c0_23, %c0_24] : memref<16x4x8xbf16, #tpu.memory_space<vmem>>, vector<1x4x8xbf16>
    %46 = vector.shape_cast %45 : vector<1x4x8xbf16> to vector<4x8xbf16>
    %cst_25 = arith.constant dense<0.000000e+00> : vector<64x8xf32>
    %47 = tpu.matmul %44, %46, %cst_25 {dimension_numbers = #tpu.dot_dimension_numbers<[1], [0], [0], [1], [0, 0, 1, 1], [], []>} : vector<64x4xbf16>, vector<4x8xbf16>, vector<64x8xf32> -> vector<64x8xf32>
    %48 = arith.addf %41, %47 : vector<64x8xf32>
    %49 = vector.extract_strided_slice %34 {offsets = [1, 0, 0], sizes = [8, 8, 4], strides = [1, 1, 1]} : vector<9x9x4xf32> to vector<8x8x4xf32>
    %50 = vector.shape_cast %49 : vector<8x8x4xf32> to vector<64x4xf32>
    %51 = arith.truncf %50 : vector<64x4xf32> to vector<64x4xbf16>
    %c9 = arith.constant 9 : index
    %c0_26 = arith.constant 0 : index
    %c0_27 = arith.constant 0 : index
    %52 = vector.load %arg2[%c9, %c0_26, %c0_27] : memref<16x4x8xbf16, #tpu.memory_space<vmem>>, vector<1x4x8xbf16>
    %53 = vector.shape_cast %52 : vector<1x4x8xbf16> to vector<4x8xbf16>
    %cst_28 = arith.constant dense<0.000000e+00> : vector<64x8xf32>
    %54 = tpu.matmul %51, %53, %cst_28 {dimension_numbers = #tpu.dot_dimension_numbers<[1], [0], [0], [1], [0, 0, 1, 1], [], []>} : vector<64x4xbf16>, vector<4x8xbf16>, vector<64x8xf32> -> vector<64x8xf32>
    %55 = arith.addf %48, %54 : vector<64x8xf32>
    %56 = vector.extract_strided_slice %34 {offsets = [1, 1, 0], sizes = [8, 8, 4], strides = [1, 1, 1]} : vector<9x9x4xf32> to vector<8x8x4xf32>
    %57 = vector.shape_cast %56 : vector<8x8x4xf32> to vector<64x4xf32>
    %58 = arith.truncf %57 : vector<64x4xf32> to vector<64x4xbf16>
    %c11 = arith.constant 11 : index
    %c0_29 = arith.constant 0 : index
    %c0_30 = arith.constant 0 : index
    %59 = vector.load %arg2[%c11, %c0_29, %c0_30] : memref<16x4x8xbf16, #tpu.memory_space<vmem>>, vector<1x4x8xbf16>
    %60 = vector.shape_cast %59 : vector<1x4x8xbf16> to vector<4x8xbf16>
    %cst_31 = arith.constant dense<0.000000e+00> : vector<64x8xf32>
    %61 = tpu.matmul %58, %60, %cst_31 {dimension_numbers = #tpu.dot_dimension_numbers<[1], [0], [0], [1], [0, 0, 1, 1], [], []>} : vector<64x4xbf16>, vector<4x8xbf16>, vector<64x8xf32> -> vector<64x8xf32>
    %62 = arith.addf %55, %61 : vector<64x8xf32>
    %c2_32 = arith.constant 2 : index
    %c0_33 = arith.constant 0 : index
    %c0_34 = arith.constant 0 : index
    %c0_35 = arith.constant 0 : index
    %63 = vector.load %arg1[%c2_32, %c0_33, %c0_34, %c0_35] : memref<4x9x9x4xbf16, #tpu.memory_space<vmem>>, vector<1x9x9x4xbf16>
    %64 = vector.shape_cast %63 : vector<1x9x9x4xbf16> to vector<9x9x4xbf16>
    %65 = arith.extf %64 : vector<9x9x4xbf16> to vector<9x9x4xf32>
    %66 = vector.extract_strided_slice %65 {offsets = [0, 0, 0], sizes = [8, 8, 4], strides = [1, 1, 1]} : vector<9x9x4xf32> to vector<8x8x4xf32>
    %67 = vector.shape_cast %66 : vector<8x8x4xf32> to vector<64x4xf32>
    %68 = arith.truncf %67 : vector<64x4xf32> to vector<64x4xbf16>
    %c4 = arith.constant 4 : index
    %c0_36 = arith.constant 0 : index
    %c0_37 = arith.constant 0 : index
    %69 = vector.load %arg2[%c4, %c0_36, %c0_37] : memref<16x4x8xbf16, #tpu.memory_space<vmem>>, vector<1x4x8xbf16>
    %70 = vector.shape_cast %69 : vector<1x4x8xbf16> to vector<4x8xbf16>
    %cst_38 = arith.constant dense<0.000000e+00> : vector<64x8xf32>
    %71 = tpu.matmul %68, %70, %cst_38 {dimension_numbers = #tpu.dot_dimension_numbers<[1], [0], [0], [1], [0, 0, 1, 1], [], []>} : vector<64x4xbf16>, vector<4x8xbf16>, vector<64x8xf32> -> vector<64x8xf32>
    %72 = arith.addf %62, %71 : vector<64x8xf32>
    %73 = vector.extract_strided_slice %65 {offsets = [0, 1, 0], sizes = [8, 8, 4], strides = [1, 1, 1]} : vector<9x9x4xf32> to vector<8x8x4xf32>
    %74 = vector.shape_cast %73 : vector<8x8x4xf32> to vector<64x4xf32>
    %75 = arith.truncf %74 : vector<64x4xf32> to vector<64x4xbf16>
    %c6 = arith.constant 6 : index
    %c0_39 = arith.constant 0 : index
    %c0_40 = arith.constant 0 : index
    %76 = vector.load %arg2[%c6, %c0_39, %c0_40] : memref<16x4x8xbf16, #tpu.memory_space<vmem>>, vector<1x4x8xbf16>
    %77 = vector.shape_cast %76 : vector<1x4x8xbf16> to vector<4x8xbf16>
    %cst_41 = arith.constant dense<0.000000e+00> : vector<64x8xf32>
    %78 = tpu.matmul %75, %77, %cst_41 {dimension_numbers = #tpu.dot_dimension_numbers<[1], [0], [0], [1], [0, 0, 1, 1], [], []>} : vector<64x4xbf16>, vector<4x8xbf16>, vector<64x8xf32> -> vector<64x8xf32>
    %79 = arith.addf %72, %78 : vector<64x8xf32>
    %80 = vector.extract_strided_slice %65 {offsets = [1, 0, 0], sizes = [8, 8, 4], strides = [1, 1, 1]} : vector<9x9x4xf32> to vector<8x8x4xf32>
    %81 = vector.shape_cast %80 : vector<8x8x4xf32> to vector<64x4xf32>
    %82 = arith.truncf %81 : vector<64x4xf32> to vector<64x4xbf16>
    %c12 = arith.constant 12 : index
    %c0_42 = arith.constant 0 : index
    %c0_43 = arith.constant 0 : index
    %83 = vector.load %arg2[%c12, %c0_42, %c0_43] : memref<16x4x8xbf16, #tpu.memory_space<vmem>>, vector<1x4x8xbf16>
    %84 = vector.shape_cast %83 : vector<1x4x8xbf16> to vector<4x8xbf16>
    %cst_44 = arith.constant dense<0.000000e+00> : vector<64x8xf32>
    %85 = tpu.matmul %82, %84, %cst_44 {dimension_numbers = #tpu.dot_dimension_numbers<[1], [0], [0], [1], [0, 0, 1, 1], [], []>} : vector<64x4xbf16>, vector<4x8xbf16>, vector<64x8xf32> -> vector<64x8xf32>
    %86 = arith.addf %79, %85 : vector<64x8xf32>
    %87 = vector.extract_strided_slice %65 {offsets = [1, 1, 0], sizes = [8, 8, 4], strides = [1, 1, 1]} : vector<9x9x4xf32> to vector<8x8x4xf32>
    %88 = vector.shape_cast %87 : vector<8x8x4xf32> to vector<64x4xf32>
    %89 = arith.truncf %88 : vector<64x4xf32> to vector<64x4xbf16>
    %c14 = arith.constant 14 : index
    %c0_45 = arith.constant 0 : index
    %c0_46 = arith.constant 0 : index
    %90 = vector.load %arg2[%c14, %c0_45, %c0_46] : memref<16x4x8xbf16, #tpu.memory_space<vmem>>, vector<1x4x8xbf16>
    %91 = vector.shape_cast %90 : vector<1x4x8xbf16> to vector<4x8xbf16>
    %cst_47 = arith.constant dense<0.000000e+00> : vector<64x8xf32>
    %92 = tpu.matmul %89, %91, %cst_47 {dimension_numbers = #tpu.dot_dimension_numbers<[1], [0], [0], [1], [0, 0, 1, 1], [], []>} : vector<64x4xbf16>, vector<4x8xbf16>, vector<64x8xf32> -> vector<64x8xf32>
    %93 = arith.addf %86, %92 : vector<64x8xf32>
    %c3_48 = arith.constant 3 : index
    %c0_49 = arith.constant 0 : index
    %c0_50 = arith.constant 0 : index
    %c0_51 = arith.constant 0 : index
    %94 = vector.load %arg1[%c3_48, %c0_49, %c0_50, %c0_51] : memref<4x9x9x4xbf16, #tpu.memory_space<vmem>>, vector<1x9x9x4xbf16>
    %95 = vector.shape_cast %94 : vector<1x9x9x4xbf16> to vector<9x9x4xbf16>
    %96 = arith.extf %95 : vector<9x9x4xbf16> to vector<9x9x4xf32>
    %97 = vector.extract_strided_slice %96 {offsets = [0, 0, 0], sizes = [8, 8, 4], strides = [1, 1, 1]} : vector<9x9x4xf32> to vector<8x8x4xf32>
    %98 = vector.shape_cast %97 : vector<8x8x4xf32> to vector<64x4xf32>
    %99 = arith.truncf %98 : vector<64x4xf32> to vector<64x4xbf16>
    %c5 = arith.constant 5 : index
    %c0_52 = arith.constant 0 : index
    %c0_53 = arith.constant 0 : index
    %100 = vector.load %arg2[%c5, %c0_52, %c0_53] : memref<16x4x8xbf16, #tpu.memory_space<vmem>>, vector<1x4x8xbf16>
    %101 = vector.shape_cast %100 : vector<1x4x8xbf16> to vector<4x8xbf16>
    %cst_54 = arith.constant dense<0.000000e+00> : vector<64x8xf32>
    %102 = tpu.matmul %99, %101, %cst_54 {dimension_numbers = #tpu.dot_dimension_numbers<[1], [0], [0], [1], [0, 0, 1, 1], [], []>} : vector<64x4xbf16>, vector<4x8xbf16>, vector<64x8xf32> -> vector<64x8xf32>
    %103 = arith.addf %93, %102 : vector<64x8xf32>
    %104 = vector.extract_strided_slice %96 {offsets = [0, 1, 0], sizes = [8, 8, 4], strides = [1, 1, 1]} : vector<9x9x4xf32> to vector<8x8x4xf32>
    %105 = vector.shape_cast %104 : vector<8x8x4xf32> to vector<64x4xf32>
    %106 = arith.truncf %105 : vector<64x4xf32> to vector<64x4xbf16>
    %c7 = arith.constant 7 : index
    %c0_55 = arith.constant 0 : index
    %c0_56 = arith.constant 0 : index
    %107 = vector.load %arg2[%c7, %c0_55, %c0_56] : memref<16x4x8xbf16, #tpu.memory_space<vmem>>, vector<1x4x8xbf16>
    %108 = vector.shape_cast %107 : vector<1x4x8xbf16> to vector<4x8xbf16>
    %cst_57 = arith.constant dense<0.000000e+00> : vector<64x8xf32>
    %109 = tpu.matmul %106, %108, %cst_57 {dimension_numbers = #tpu.dot_dimension_numbers<[1], [0], [0], [1], [0, 0, 1, 1], [], []>} : vector<64x4xbf16>, vector<4x8xbf16>, vector<64x8xf32> -> vector<64x8xf32>
    %110 = arith.addf %103, %109 : vector<64x8xf32>
    %111 = vector.extract_strided_slice %96 {offsets = [1, 0, 0], sizes = [8, 8, 4], strides = [1, 1, 1]} : vector<9x9x4xf32> to vector<8x8x4xf32>
    %112 = vector.shape_cast %111 : vector<8x8x4xf32> to vector<64x4xf32>
    %113 = arith.truncf %112 : vector<64x4xf32> to vector<64x4xbf16>
    %c13 = arith.constant 13 : index
    %c0_58 = arith.constant 0 : index
    %c0_59 = arith.constant 0 : index
    %114 = vector.load %arg2[%c13, %c0_58, %c0_59] : memref<16x4x8xbf16, #tpu.memory_space<vmem>>, vector<1x4x8xbf16>
    %115 = vector.shape_cast %114 : vector<1x4x8xbf16> to vector<4x8xbf16>
    %cst_60 = arith.constant dense<0.000000e+00> : vector<64x8xf32>
    %116 = tpu.matmul %113, %115, %cst_60 {dimension_numbers = #tpu.dot_dimension_numbers<[1], [0], [0], [1], [0, 0, 1, 1], [], []>} : vector<64x4xbf16>, vector<4x8xbf16>, vector<64x8xf32> -> vector<64x8xf32>
    %117 = arith.addf %110, %116 : vector<64x8xf32>
    %118 = vector.extract_strided_slice %96 {offsets = [1, 1, 0], sizes = [8, 8, 4], strides = [1, 1, 1]} : vector<9x9x4xf32> to vector<8x8x4xf32>
    %119 = vector.shape_cast %118 : vector<8x8x4xf32> to vector<64x4xf32>
    %120 = arith.truncf %119 : vector<64x4xf32> to vector<64x4xbf16>
    %c15 = arith.constant 15 : index
    %c0_61 = arith.constant 0 : index
    %c0_62 = arith.constant 0 : index
    %121 = vector.load %arg2[%c15, %c0_61, %c0_62] : memref<16x4x8xbf16, #tpu.memory_space<vmem>>, vector<1x4x8xbf16>
    %122 = vector.shape_cast %121 : vector<1x4x8xbf16> to vector<4x8xbf16>
    %cst_63 = arith.constant dense<0.000000e+00> : vector<64x8xf32>
    %123 = tpu.matmul %120, %122, %cst_63 {dimension_numbers = #tpu.dot_dimension_numbers<[1], [0], [0], [1], [0, 0, 1, 1], [], []>} : vector<64x4xbf16>, vector<4x8xbf16>, vector<64x8xf32> -> vector<64x8xf32>
    %124 = arith.addf %117, %123 : vector<64x8xf32>
    %c0_64 = arith.constant 0 : index
    %c0_65 = arith.constant 0 : index
    %125 = vector.load %arg3[%c0_64, %c0_65] : memref<1x8xf32, #tpu.memory_space<vmem>>, vector<1x8xf32>
    %126 = vector.broadcast %125 : vector<1x8xf32> to vector<64x8xf32>
    %127 = arith.addf %124, %126 : vector<64x8xf32>
    %128 = arith.truncf %127 : vector<64x8xf32> to vector<64x8xbf16>
    %c0_66 = arith.constant 0 : index
    %c0_67 = arith.constant 0 : index
    %129 = vector.load %arg8[%c0_66, %c0_67] : memref<8x8xbf16, #tpu.memory_space<vmem>>, vector<8x8xbf16>
    %cst_68 = arith.constant dense<0.000000e+00> : vector<64x8xf32>
    %130 = tpu.matmul %128, %129, %cst_68 {dimension_numbers = #tpu.dot_dimension_numbers<[1], [0], [0], [1], [0, 0, 1, 1], [], []>} : vector<64x8xbf16>, vector<8x8xbf16>, vector<64x8xf32> -> vector<64x8xf32>
    %c0_69 = arith.constant 0 : index
    %c0_70 = arith.constant 0 : index
    %131 = vector.load %arg9[%c0_69, %c0_70] : memref<1x8xf32, #tpu.memory_space<vmem>>, vector<1x8xf32>
    %132 = vector.broadcast %131 : vector<1x8xf32> to vector<64x8xf32>
    %133 = arith.addf %130, %132 : vector<64x8xf32>
    %cst_71 = arith.constant 0.000000e+00 : f32
    %134 = vector.broadcast %cst_71 : f32 to vector<10x10x8xf32>
    %c0_72 = arith.constant 0 : index
    %c0_73 = arith.constant 0 : index
    %c0_74 = arith.constant 0 : index
    %135 = vector.load %arg11[%c0_72, %c0_73, %c0_74] : memref<10x10x8xf32, #tpu.memory_space<vmem>>, vector<10x10x8xf32>
    tpu.vector_store %arg11[%c0_72, %c0_73, %c0_74], %134 {strides = array<i32>} : memref<10x10x8xf32, #tpu.memory_space<vmem>>, vector<10x10x8xf32>,
    %136 = vector.shape_cast %127 : vector<64x8xf32> to vector<8x8x8xf32>
    %c1_75 = arith.constant 1 : index
    %c1_76 = arith.constant 1 : index
    %c0_77 = arith.constant 0 : index
    %137 = vector.load %arg11[%c1_75, %c1_76, %c0_77] : memref<10x10x8xf32, #tpu.memory_space<vmem>>, vector<8x8x8xf32>
    tpu.vector_store %arg11[%c1_75, %c1_76, %c0_77], %136 {strides = array<i32>} : memref<10x10x8xf32, #tpu.memory_space<vmem>>, vector<8x8x8xf32>,
    %cst_78 = arith.constant 0.000000e+00 : f32
    %138 = vector.broadcast %cst_78 : f32 to vector<64x8xf32>
    %c0_79 = arith.constant 0 : index
    %c0_80 = arith.constant 0 : index
    %c0_81 = arith.constant 0 : index
    %139 = vector.load %arg11[%c0_79, %c0_80, %c0_81] : memref<10x10x8xf32, #tpu.memory_space<vmem>>, vector<8x8x8xf32>
    %140 = vector.shape_cast %139 : vector<8x8x8xf32> to vector<64x8xf32>
    %141 = arith.truncf %140 : vector<64x8xf32> to vector<64x8xbf16>
    %c0_82 = arith.constant 0 : index
    %c0_83 = arith.constant 0 : index
    %c0_84 = arith.constant 0 : index
    %142 = vector.load %arg4[%c0_82, %c0_83, %c0_84] : memref<9x8x8xbf16, #tpu.memory_space<vmem>>, vector<1x8x8xbf16>
    %143 = vector.shape_cast %142 : vector<1x8x8xbf16> to vector<8x8xbf16>
    %cst_85 = arith.constant dense<0.000000e+00> : vector<64x8xf32>
    %144 = tpu.matmul %141, %143, %cst_85 {dimension_numbers = #tpu.dot_dimension_numbers<[1], [0], [0], [1], [0, 0, 1, 1], [], []>} : vector<64x8xbf16>, vector<8x8xbf16>, vector<64x8xf32> -> vector<64x8xf32>
    %145 = arith.addf %138, %144 : vector<64x8xf32>
    %c0_86 = arith.constant 0 : index
    %c1_87 = arith.constant 1 : index
    %c0_88 = arith.constant 0 : index
    %146 = vector.load %arg11[%c0_86, %c1_87, %c0_88] : memref<10x10x8xf32, #tpu.memory_space<vmem>>, vector<8x8x8xf32>
    %147 = vector.shape_cast %146 : vector<8x8x8xf32> to vector<64x8xf32>
    %148 = arith.truncf %147 : vector<64x8xf32> to vector<64x8xbf16>
    %c1_89 = arith.constant 1 : index
    %c0_90 = arith.constant 0 : index
    %c0_91 = arith.constant 0 : index
    %149 = vector.load %arg4[%c1_89, %c0_90, %c0_91] : memref<9x8x8xbf16, #tpu.memory_space<vmem>>, vector<1x8x8xbf16>
    %150 = vector.shape_cast %149 : vector<1x8x8xbf16> to vector<8x8xbf16>
    %cst_92 = arith.constant dense<0.000000e+00> : vector<64x8xf32>
    %151 = tpu.matmul %148, %150, %cst_92 {dimension_numbers = #tpu.dot_dimension_numbers<[1], [0], [0], [1], [0, 0, 1, 1], [], []>} : vector<64x8xbf16>, vector<8x8xbf16>, vector<64x8xf32> -> vector<64x8xf32>
    %152 = arith.addf %145, %151 : vector<64x8xf32>
    %c0_93 = arith.constant 0 : index
    %c2_94 = arith.constant 2 : index
    %c0_95 = arith.constant 0 : index
    %153 = vector.load %arg11[%c0_93, %c2_94, %c0_95] : memref<10x10x8xf32, #tpu.memory_space<vmem>>, vector<8x8x8xf32>
    %154 = vector.shape_cast %153 : vector<8x8x8xf32> to vector<64x8xf32>
    %155 = arith.truncf %154 : vector<64x8xf32> to vector<64x8xbf16>
    %c2_96 = arith.constant 2 : index
    %c0_97 = arith.constant 0 : index
    %c0_98 = arith.constant 0 : index
    %156 = vector.load %arg4[%c2_96, %c0_97, %c0_98] : memref<9x8x8xbf16, #tpu.memory_space<vmem>>, vector<1x8x8xbf16>
    %157 = vector.shape_cast %156 : vector<1x8x8xbf16> to vector<8x8xbf16>
    %cst_99 = arith.constant dense<0.000000e+00> : vector<64x8xf32>
    %158 = tpu.matmul %155, %157, %cst_99 {dimension_numbers = #tpu.dot_dimension_numbers<[1], [0], [0], [1], [0, 0, 1, 1], [], []>} : vector<64x8xbf16>, vector<8x8xbf16>, vector<64x8xf32> -> vector<64x8xf32>
    %159 = arith.addf %152, %158 : vector<64x8xf32>
    %c1_100 = arith.constant 1 : index
    %c0_101 = arith.constant 0 : index
    %c0_102 = arith.constant 0 : index
    %160 = vector.load %arg11[%c1_100, %c0_101, %c0_102] : memref<10x10x8xf32, #tpu.memory_space<vmem>>, vector<8x8x8xf32>
    %161 = vector.shape_cast %160 : vector<8x8x8xf32> to vector<64x8xf32>
    %162 = arith.truncf %161 : vector<64x8xf32> to vector<64x8xbf16>
    %c3_103 = arith.constant 3 : index
    %c0_104 = arith.constant 0 : index
    %c0_105 = arith.constant 0 : index
    %163 = vector.load %arg4[%c3_103, %c0_104, %c0_105] : memref<9x8x8xbf16, #tpu.memory_space<vmem>>, vector<1x8x8xbf16>
    %164 = vector.shape_cast %163 : vector<1x8x8xbf16> to vector<8x8xbf16>
    %cst_106 = arith.constant dense<0.000000e+00> : vector<64x8xf32>
    %165 = tpu.matmul %162, %164, %cst_106 {dimension_numbers = #tpu.dot_dimension_numbers<[1], [0], [0], [1], [0, 0, 1, 1], [], []>} : vector<64x8xbf16>, vector<8x8xbf16>, vector<64x8xf32> -> vector<64x8xf32>
    %166 = arith.addf %159, %165 : vector<64x8xf32>
    %c1_107 = arith.constant 1 : index
    %c1_108 = arith.constant 1 : index
    %c0_109 = arith.constant 0 : index
    %167 = vector.load %arg11[%c1_107, %c1_108, %c0_109] : memref<10x10x8xf32, #tpu.memory_space<vmem>>, vector<8x8x8xf32>
    %168 = vector.shape_cast %167 : vector<8x8x8xf32> to vector<64x8xf32>
    %169 = arith.truncf %168 : vector<64x8xf32> to vector<64x8xbf16>
    %c4_110 = arith.constant 4 : index
    %c0_111 = arith.constant 0 : index
    %c0_112 = arith.constant 0 : index
    %170 = vector.load %arg4[%c4_110, %c0_111, %c0_112] : memref<9x8x8xbf16, #tpu.memory_space<vmem>>, vector<1x8x8xbf16>
    %171 = vector.shape_cast %170 : vector<1x8x8xbf16> to vector<8x8xbf16>
    %cst_113 = arith.constant dense<0.000000e+00> : vector<64x8xf32>
    %172 = tpu.matmul %169, %171, %cst_113 {dimension_numbers = #tpu.dot_dimension_numbers<[1], [0], [0], [1], [0, 0, 1, 1], [], []>} : vector<64x8xbf16>, vector<8x8xbf16>, vector<64x8xf32> -> vector<64x8xf32>
    %173 = arith.addf %166, %172 : vector<64x8xf32>
    %c1_114 = arith.constant 1 : index
    %c2_115 = arith.constant 2 : index
    %c0_116 = arith.constant 0 : index
    %174 = vector.load %arg11[%c1_114, %c2_115, %c0_116] : memref<10x10x8xf32, #tpu.memory_space<vmem>>, vector<8x8x8xf32>
    %175 = vector.shape_cast %174 : vector<8x8x8xf32> to vector<64x8xf32>
    %176 = arith.truncf %175 : vector<64x8xf32> to vector<64x8xbf16>
    %c5_117 = arith.constant 5 : index
    %c0_118 = arith.constant 0 : index
    %c0_119 = arith.constant 0 : index
    %177 = vector.load %arg4[%c5_117, %c0_118, %c0_119] : memref<9x8x8xbf16, #tpu.memory_space<vmem>>, vector<1x8x8xbf16>
    %178 = vector.shape_cast %177 : vector<1x8x8xbf16> to vector<8x8xbf16>
    %cst_120 = arith.constant dense<0.000000e+00> : vector<64x8xf32>
    %179 = tpu.matmul %176, %178, %cst_120 {dimension_numbers = #tpu.dot_dimension_numbers<[1], [0], [0], [1], [0, 0, 1, 1], [], []>} : vector<64x8xbf16>, vector<8x8xbf16>, vector<64x8xf32> -> vector<64x8xf32>
    %180 = arith.addf %173, %179 : vector<64x8xf32>
    %c2_121 = arith.constant 2 : index
    %c0_122 = arith.constant 0 : index
    %c0_123 = arith.constant 0 : index
    %181 = vector.load %arg11[%c2_121, %c0_122, %c0_123] : memref<10x10x8xf32, #tpu.memory_space<vmem>>, vector<8x8x8xf32>
    %182 = vector.shape_cast %181 : vector<8x8x8xf32> to vector<64x8xf32>
    %183 = arith.truncf %182 : vector<64x8xf32> to vector<64x8xbf16>
    %c6_124 = arith.constant 6 : index
    %c0_125 = arith.constant 0 : index
    %c0_126 = arith.constant 0 : index
    %184 = vector.load %arg4[%c6_124, %c0_125, %c0_126] : memref<9x8x8xbf16, #tpu.memory_space<vmem>>, vector<1x8x8xbf16>
    %185 = vector.shape_cast %184 : vector<1x8x8xbf16> to vector<8x8xbf16>
    %cst_127 = arith.constant dense<0.000000e+00> : vector<64x8xf32>
    %186 = tpu.matmul %183, %185, %cst_127 {dimension_numbers = #tpu.dot_dimension_numbers<[1], [0], [0], [1], [0, 0, 1, 1], [], []>} : vector<64x8xbf16>, vector<8x8xbf16>, vector<64x8xf32> -> vector<64x8xf32>
    %187 = arith.addf %180, %186 : vector<64x8xf32>
    %c2_128 = arith.constant 2 : index
    %c1_129 = arith.constant 1 : index
    %c0_130 = arith.constant 0 : index
    %188 = vector.load %arg11[%c2_128, %c1_129, %c0_130] : memref<10x10x8xf32, #tpu.memory_space<vmem>>, vector<8x8x8xf32>
    %189 = vector.shape_cast %188 : vector<8x8x8xf32> to vector<64x8xf32>
    %190 = arith.truncf %189 : vector<64x8xf32> to vector<64x8xbf16>
    %c7_131 = arith.constant 7 : index
    %c0_132 = arith.constant 0 : index
    %c0_133 = arith.constant 0 : index
    %191 = vector.load %arg4[%c7_131, %c0_132, %c0_133] : memref<9x8x8xbf16, #tpu.memory_space<vmem>>, vector<1x8x8xbf16>
    %192 = vector.shape_cast %191 : vector<1x8x8xbf16> to vector<8x8xbf16>
    %cst_134 = arith.constant dense<0.000000e+00> : vector<64x8xf32>
    %193 = tpu.matmul %190, %192, %cst_134 {dimension_numbers = #tpu.dot_dimension_numbers<[1], [0], [0], [1], [0, 0, 1, 1], [], []>} : vector<64x8xbf16>, vector<8x8xbf16>, vector<64x8xf32> -> vector<64x8xf32>
    %194 = arith.addf %187, %193 : vector<64x8xf32>
    %c2_135 = arith.constant 2 : index
    %c2_136 = arith.constant 2 : index
    %c0_137 = arith.constant 0 : index
    %195 = vector.load %arg11[%c2_135, %c2_136, %c0_137] : memref<10x10x8xf32, #tpu.memory_space<vmem>>, vector<8x8x8xf32>
    %196 = vector.shape_cast %195 : vector<8x8x8xf32> to vector<64x8xf32>
    %197 = arith.truncf %196 : vector<64x8xf32> to vector<64x8xbf16>
    %c8_138 = arith.constant 8 : index
    %c0_139 = arith.constant 0 : index
    %c0_140 = arith.constant 0 : index
    %198 = vector.load %arg4[%c8_138, %c0_139, %c0_140] : memref<9x8x8xbf16, #tpu.memory_space<vmem>>, vector<1x8x8xbf16>
    %199 = vector.shape_cast %198 : vector<1x8x8xbf16> to vector<8x8xbf16>
    %cst_141 = arith.constant dense<0.000000e+00> : vector<64x8xf32>
    %200 = tpu.matmul %197, %199, %cst_141 {dimension_numbers = #tpu.dot_dimension_numbers<[1], [0], [0], [1], [0, 0, 1, 1], [], []>} : vector<64x8xbf16>, vector<8x8xbf16>, vector<64x8xf32> -> vector<64x8xf32>
    %201 = arith.addf %194, %200 : vector<64x8xf32>
    %c0_142 = arith.constant 0 : index
    %c0_143 = arith.constant 0 : index
    %202 = vector.load %arg5[%c0_142, %c0_143] : memref<1x8xf32, #tpu.memory_space<vmem>>, vector<1x8xf32>
    %203 = vector.broadcast %202 : vector<1x8xf32> to vector<64x8xf32>
    %204 = arith.addf %201, %203 : vector<64x8xf32>
    %cst_144 = arith.constant 0.000000e+00 : f32
    %205 = vector.broadcast %cst_144 : f32 to vector<64x8xf32>
    %206 = arith.cmpf ogt, %204, %205 : vector<64x8xf32>
    %cst_145 = arith.constant 0.00999999977 : f32
    %207 = vector.broadcast %cst_145 : f32 to vector<64x8xf32>
    %208 = arith.mulf %207, %204 : vector<64x8xf32>
    %209 = arith.select %206, %204, %208 : vector<64x8xi1>, vector<64x8xf32>
    %210 = vector.shape_cast %209 : vector<64x8xf32> to vector<8x8x8xf32>
    %c1_146 = arith.constant 1 : index
    %c1_147 = arith.constant 1 : index
    %c0_148 = arith.constant 0 : index
    %211 = vector.load %arg11[%c1_146, %c1_147, %c0_148] : memref<10x10x8xf32, #tpu.memory_space<vmem>>, vector<8x8x8xf32>
    tpu.vector_store %arg11[%c1_146, %c1_147, %c0_148], %210 {strides = array<i32>} : memref<10x10x8xf32, #tpu.memory_space<vmem>>, vector<8x8x8xf32>,
    %cst_149 = arith.constant 0.000000e+00 : f32
    %212 = vector.broadcast %cst_149 : f32 to vector<64x8xf32>
    %c0_150 = arith.constant 0 : index
    %c0_151 = arith.constant 0 : index
    %c0_152 = arith.constant 0 : index
    %213 = vector.load %arg11[%c0_150, %c0_151, %c0_152] : memref<10x10x8xf32, #tpu.memory_space<vmem>>, vector<8x8x8xf32>
    %214 = vector.shape_cast %213 : vector<8x8x8xf32> to vector<64x8xf32>
    %215 = arith.truncf %214 : vector<64x8xf32> to vector<64x8xbf16>
    %c0_153 = arith.constant 0 : index
    %c0_154 = arith.constant 0 : index
    %c0_155 = arith.constant 0 : index
    %216 = vector.load %arg6[%c0_153, %c0_154, %c0_155] : memref<9x8x8xbf16, #tpu.memory_space<vmem>>, vector<1x8x8xbf16>
    %217 = vector.shape_cast %216 : vector<1x8x8xbf16> to vector<8x8xbf16>
    %cst_156 = arith.constant dense<0.000000e+00> : vector<64x8xf32>
    %218 = tpu.matmul %215, %217, %cst_156 {dimension_numbers = #tpu.dot_dimension_numbers<[1], [0], [0], [1], [0, 0, 1, 1], [], []>} : vector<64x8xbf16>, vector<8x8xbf16>, vector<64x8xf32> -> vector<64x8xf32>
    %219 = arith.addf %212, %218 : vector<64x8xf32>
    %c0_157 = arith.constant 0 : index
    %c1_158 = arith.constant 1 : index
    %c0_159 = arith.constant 0 : index
    %220 = vector.load %arg11[%c0_157, %c1_158, %c0_159] : memref<10x10x8xf32, #tpu.memory_space<vmem>>, vector<8x8x8xf32>
    %221 = vector.shape_cast %220 : vector<8x8x8xf32> to vector<64x8xf32>
    %222 = arith.truncf %221 : vector<64x8xf32> to vector<64x8xbf16>
    %c1_160 = arith.constant 1 : index
    %c0_161 = arith.constant 0 : index
    %c0_162 = arith.constant 0 : index
    %223 = vector.load %arg6[%c1_160, %c0_161, %c0_162] : memref<9x8x8xbf16, #tpu.memory_space<vmem>>, vector<1x8x8xbf16>
    %224 = vector.shape_cast %223 : vector<1x8x8xbf16> to vector<8x8xbf16>
    %cst_163 = arith.constant dense<0.000000e+00> : vector<64x8xf32>
    %225 = tpu.matmul %222, %224, %cst_163 {dimension_numbers = #tpu.dot_dimension_numbers<[1], [0], [0], [1], [0, 0, 1, 1], [], []>} : vector<64x8xbf16>, vector<8x8xbf16>, vector<64x8xf32> -> vector<64x8xf32>
    %226 = arith.addf %219, %225 : vector<64x8xf32>
    %c0_164 = arith.constant 0 : index
    %c2_165 = arith.constant 2 : index
    %c0_166 = arith.constant 0 : index
    %227 = vector.load %arg11[%c0_164, %c2_165, %c0_166] : memref<10x10x8xf32, #tpu.memory_space<vmem>>, vector<8x8x8xf32>
    %228 = vector.shape_cast %227 : vector<8x8x8xf32> to vector<64x8xf32>
    %229 = arith.truncf %228 : vector<64x8xf32> to vector<64x8xbf16>
    %c2_167 = arith.constant 2 : index
    %c0_168 = arith.constant 0 : index
    %c0_169 = arith.constant 0 : index
    %230 = vector.load %arg6[%c2_167, %c0_168, %c0_169] : memref<9x8x8xbf16, #tpu.memory_space<vmem>>, vector<1x8x8xbf16>
    %231 = vector.shape_cast %230 : vector<1x8x8xbf16> to vector<8x8xbf16>
    %cst_170 = arith.constant dense<0.000000e+00> : vector<64x8xf32>
    %232 = tpu.matmul %229, %231, %cst_170 {dimension_numbers = #tpu.dot_dimension_numbers<[1], [0], [0], [1], [0, 0, 1, 1], [], []>} : vector<64x8xbf16>, vector<8x8xbf16>, vector<64x8xf32> -> vector<64x8xf32>
    %233 = arith.addf %226, %232 : vector<64x8xf32>
    %c1_171 = arith.constant 1 : index
    %c0_172 = arith.constant 0 : index
    %c0_173 = arith.constant 0 : index
    %234 = vector.load %arg11[%c1_171, %c0_172, %c0_173] : memref<10x10x8xf32, #tpu.memory_space<vmem>>, vector<8x8x8xf32>
    %235 = vector.shape_cast %234 : vector<8x8x8xf32> to vector<64x8xf32>
    %236 = arith.truncf %235 : vector<64x8xf32> to vector<64x8xbf16>
    %c3_174 = arith.constant 3 : index
    %c0_175 = arith.constant 0 : index
    %c0_176 = arith.constant 0 : index
    %237 = vector.load %arg6[%c3_174, %c0_175, %c0_176] : memref<9x8x8xbf16, #tpu.memory_space<vmem>>, vector<1x8x8xbf16>
    %238 = vector.shape_cast %237 : vector<1x8x8xbf16> to vector<8x8xbf16>
    %cst_177 = arith.constant dense<0.000000e+00> : vector<64x8xf32>
    %239 = tpu.matmul %236, %238, %cst_177 {dimension_numbers = #tpu.dot_dimension_numbers<[1], [0], [0], [1], [0, 0, 1, 1], [], []>} : vector<64x8xbf16>, vector<8x8xbf16>, vector<64x8xf32> -> vector<64x8xf32>
    %240 = arith.addf %233, %239 : vector<64x8xf32>
    %c1_178 = arith.constant 1 : index
    %c1_179 = arith.constant 1 : index
    %c0_180 = arith.constant 0 : index
    %241 = vector.load %arg11[%c1_178, %c1_179, %c0_180] : memref<10x10x8xf32, #tpu.memory_space<vmem>>, vector<8x8x8xf32>
    %242 = vector.shape_cast %241 : vector<8x8x8xf32> to vector<64x8xf32>
    %243 = arith.truncf %242 : vector<64x8xf32> to vector<64x8xbf16>
    %c4_181 = arith.constant 4 : index
    %c0_182 = arith.constant 0 : index
    %c0_183 = arith.constant 0 : index
    %244 = vector.load %arg6[%c4_181, %c0_182, %c0_183] : memref<9x8x8xbf16, #tpu.memory_space<vmem>>, vector<1x8x8xbf16>
    %245 = vector.shape_cast %244 : vector<1x8x8xbf16> to vector<8x8xbf16>
    %cst_184 = arith.constant dense<0.000000e+00> : vector<64x8xf32>
    %246 = tpu.matmul %243, %245, %cst_184 {dimension_numbers = #tpu.dot_dimension_numbers<[1], [0], [0], [1], [0, 0, 1, 1], [], []>} : vector<64x8xbf16>, vector<8x8xbf16>, vector<64x8xf32> -> vector<64x8xf32>
    %247 = arith.addf %240, %246 : vector<64x8xf32>
    %c1_185 = arith.constant 1 : index
    %c2_186 = arith.constant 2 : index
    %c0_187 = arith.constant 0 : index
    %248 = vector.load %arg11[%c1_185, %c2_186, %c0_187] : memref<10x10x8xf32, #tpu.memory_space<vmem>>, vector<8x8x8xf32>
    %249 = vector.shape_cast %248 : vector<8x8x8xf32> to vector<64x8xf32>
    %250 = arith.truncf %249 : vector<64x8xf32> to vector<64x8xbf16>
    %c5_188 = arith.constant 5 : index
    %c0_189 = arith.constant 0 : index
    %c0_190 = arith.constant 0 : index
    %251 = vector.load %arg6[%c5_188, %c0_189, %c0_190] : memref<9x8x8xbf16, #tpu.memory_space<vmem>>, vector<1x8x8xbf16>
    %252 = vector.shape_cast %251 : vector<1x8x8xbf16> to vector<8x8xbf16>
    %cst_191 = arith.constant dense<0.000000e+00> : vector<64x8xf32>
    %253 = tpu.matmul %250, %252, %cst_191 {dimension_numbers = #tpu.dot_dimension_numbers<[1], [0], [0], [1], [0, 0, 1, 1], [], []>} : vector<64x8xbf16>, vector<8x8xbf16>, vector<64x8xf32> -> vector<64x8xf32>
    %254 = arith.addf %247, %253 : vector<64x8xf32>
    %c2_192 = arith.constant 2 : index
    %c0_193 = arith.constant 0 : index
    %c0_194 = arith.constant 0 : index
    %255 = vector.load %arg11[%c2_192, %c0_193, %c0_194] : memref<10x10x8xf32, #tpu.memory_space<vmem>>, vector<8x8x8xf32>
    %256 = vector.shape_cast %255 : vector<8x8x8xf32> to vector<64x8xf32>
    %257 = arith.truncf %256 : vector<64x8xf32> to vector<64x8xbf16>
    %c6_195 = arith.constant 6 : index
    %c0_196 = arith.constant 0 : index
    %c0_197 = arith.constant 0 : index
    %258 = vector.load %arg6[%c6_195, %c0_196, %c0_197] : memref<9x8x8xbf16, #tpu.memory_space<vmem>>, vector<1x8x8xbf16>
    %259 = vector.shape_cast %258 : vector<1x8x8xbf16> to vector<8x8xbf16>
    %cst_198 = arith.constant dense<0.000000e+00> : vector<64x8xf32>
    %260 = tpu.matmul %257, %259, %cst_198 {dimension_numbers = #tpu.dot_dimension_numbers<[1], [0], [0], [1], [0, 0, 1, 1], [], []>} : vector<64x8xbf16>, vector<8x8xbf16>, vector<64x8xf32> -> vector<64x8xf32>
    %261 = arith.addf %254, %260 : vector<64x8xf32>
    %c2_199 = arith.constant 2 : index
    %c1_200 = arith.constant 1 : index
    %c0_201 = arith.constant 0 : index
    %262 = vector.load %arg11[%c2_199, %c1_200, %c0_201] : memref<10x10x8xf32, #tpu.memory_space<vmem>>, vector<8x8x8xf32>
    %263 = vector.shape_cast %262 : vector<8x8x8xf32> to vector<64x8xf32>
    %264 = arith.truncf %263 : vector<64x8xf32> to vector<64x8xbf16>
    %c7_202 = arith.constant 7 : index
    %c0_203 = arith.constant 0 : index
    %c0_204 = arith.constant 0 : index
    %265 = vector.load %arg6[%c7_202, %c0_203, %c0_204] : memref<9x8x8xbf16, #tpu.memory_space<vmem>>, vector<1x8x8xbf16>
    %266 = vector.shape_cast %265 : vector<1x8x8xbf16> to vector<8x8xbf16>
    %cst_205 = arith.constant dense<0.000000e+00> : vector<64x8xf32>
    %267 = tpu.matmul %264, %266, %cst_205 {dimension_numbers = #tpu.dot_dimension_numbers<[1], [0], [0], [1], [0, 0, 1, 1], [], []>} : vector<64x8xbf16>, vector<8x8xbf16>, vector<64x8xf32> -> vector<64x8xf32>
    %268 = arith.addf %261, %267 : vector<64x8xf32>
    %c2_206 = arith.constant 2 : index
    %c2_207 = arith.constant 2 : index
    %c0_208 = arith.constant 0 : index
    %269 = vector.load %arg11[%c2_206, %c2_207, %c0_208] : memref<10x10x8xf32, #tpu.memory_space<vmem>>, vector<8x8x8xf32>
    %270 = vector.shape_cast %269 : vector<8x8x8xf32> to vector<64x8xf32>
    %271 = arith.truncf %270 : vector<64x8xf32> to vector<64x8xbf16>
    %c8_209 = arith.constant 8 : index
    %c0_210 = arith.constant 0 : index
    %c0_211 = arith.constant 0 : index
    %272 = vector.load %arg6[%c8_209, %c0_210, %c0_211] : memref<9x8x8xbf16, #tpu.memory_space<vmem>>, vector<1x8x8xbf16>
    %273 = vector.shape_cast %272 : vector<1x8x8xbf16> to vector<8x8xbf16>
    %cst_212 = arith.constant dense<0.000000e+00> : vector<64x8xf32>
    %274 = tpu.matmul %271, %273, %cst_212 {dimension_numbers = #tpu.dot_dimension_numbers<[1], [0], [0], [1], [0, 0, 1, 1], [], []>} : vector<64x8xbf16>, vector<8x8xbf16>, vector<64x8xf32> -> vector<64x8xf32>
    %275 = arith.addf %268, %274 : vector<64x8xf32>
    %c0_213 = arith.constant 0 : index
    %c0_214 = arith.constant 0 : index
    %276 = vector.load %arg7[%c0_213, %c0_214] : memref<1x8xf32, #tpu.memory_space<vmem>>, vector<1x8xf32>
    %277 = vector.broadcast %276 : vector<1x8xf32> to vector<64x8xf32>
    %278 = arith.addf %275, %277 : vector<64x8xf32>
    %cst_215 = arith.constant 0.000000e+00 : f32
    %279 = vector.broadcast %cst_215 : f32 to vector<64x8xf32>
    %280 = arith.cmpf ogt, %278, %279 : vector<64x8xf32>
    %cst_216 = arith.constant 0.00999999977 : f32
    %281 = vector.broadcast %cst_216 : f32 to vector<64x8xf32>
    %282 = arith.mulf %281, %278 : vector<64x8xf32>
    %283 = arith.select %280, %278, %282 : vector<64x8xi1>, vector<64x8xf32>
    %284 = arith.addf %283, %133 : vector<64x8xf32>
    %285 = vector.shape_cast %284 : vector<64x8xf32> to vector<1x8x8x8xf32>
    %c0_217 = arith.constant 0 : index
    %c0_218 = arith.constant 0 : index
    %c0_219 = arith.constant 0 : index
    %c0_220 = arith.constant 0 : index
    %286 = vector.load %arg10[%c0_217, %c0_218, %c0_219, %c0_220] : memref<1x8x8x8xf32, #tpu.memory_space<vmem>>, vector<1x8x8x8xf32>
    tpu.vector_store %arg10[%c0_217, %c0_218, %c0_219, %c0_220], %285 {strides = array<i32>} : memref<1x8x8x8xf32, #tpu.memory_space<vmem>>, vector<1x8x8x8xf32>,
    return
  }
  func.func @transform_0(%arg0: i32) -> (i32, i32, i32, i32) {
    %c0_i32 = arith.constant 0 : i32
    %c0_i32_0 = arith.constant 0 : i32
    %c0_i32_1 = arith.constant 0 : i32
    %c0_i32_2 = arith.constant 0 : i32
    return %arg0, %c0_i32, %c0_i32_0, %c0_i32_1 : i32, i32, i32, i32
  }
  func.func @transform_1(%arg0: i32) -> (i32, i32, i32) {
    %c0_i32 = arith.constant 0 : i32
    %c0_i32_0 = arith.constant 0 : i32
    %c0_i32_1 = arith.constant 0 : i32
    %c0_i32_2 = arith.constant 0 : i32
    return %c0_i32, %c0_i32_0, %c0_i32_1 : i32, i32, i32
  }
  func.func @transform_2(%arg0: i32) -> (i32, i32) {
    %c0_i32 = arith.constant 0 : i32
    %c0_i32_0 = arith.constant 0 : i32
    %c0_i32_1 = arith.constant 0 : i32
    return %c0_i32, %c0_i32_0 : i32, i32
  }
  func.func @transform_3(%arg0: i32) -> (i32, i32, i32) {
    %c0_i32 = arith.constant 0 : i32
    %c0_i32_0 = arith.constant 0 : i32
    %c0_i32_1 = arith.constant 0 : i32
    %c0_i32_2 = arith.constant 0 : i32
    return %c0_i32, %c0_i32_0, %c0_i32_1 : i32, i32, i32
  }
  func.func @transform_4(%arg0: i32) -> (i32, i32) {
    %c0_i32 = arith.constant 0 : i32
    %c0_i32_0 = arith.constant 0 : i32
    %c0_i32_1 = arith.constant 0 : i32
    return %c0_i32, %c0_i32_0 : i32, i32
  }
  func.func @transform_5(%arg0: i32) -> (i32, i32, i32) {
    %c0_i32 = arith.constant 0 : i32
    %c0_i32_0 = arith.constant 0 : i32
    %c0_i32_1 = arith.constant 0 : i32
    %c0_i32_2 = arith.constant 0 : i32
    return %c0_i32, %c0_i32_0, %c0_i32_1 : i32, i32, i32
  }
  func.func @transform_6(%arg0: i32) -> (i32, i32) {
    %c0_i32 = arith.constant 0 : i32
    %c0_i32_0 = arith.constant 0 : i32
    %c0_i32_1 = arith.constant 0 : i32
    return %c0_i32, %c0_i32_0 : i32, i32
  }
  func.func @transform_7(%arg0: i32) -> (i32, i32) {
    %c0_i32 = arith.constant 0 : i32
    %c0_i32_0 = arith.constant 0 : i32
    %c0_i32_1 = arith.constant 0 : i32
    return %c0_i32, %c0_i32_0 : i32, i32
  }
  func.func @transform_8(%arg0: i32) -> (i32, i32) {
    %c0_i32 = arith.constant 0 : i32
    %c0_i32_0 = arith.constant 0 : i32
    %c0_i32_1 = arith.constant 0 : i32
    return %c0_i32, %c0_i32_0 : i32, i32
  }
  func.func @transform_9(%arg0: i32) -> (i32, i32, i32, i32) {
    %c0_i32 = arith.constant 0 : i32
    %c0_i32_0 = arith.constant 0 : i32
    %c0_i32_1 = arith.constant 0 : i32
    %c0_i32_2 = arith.constant 0 : i32
    return %arg0, %c0_i32, %c0_i32_0, %c0_i32_1 : i32, i32, i32, i32
  }
}

</mosaic_0001>

<bundles_post_ra>
// kernel: down_conv_forward.1
= control target key start
LH: loop header
LB: loop body
LE: loop exit
PB: predicated region body
PF: predicated region fallthrough
CT: control target
= control target key end

     0   :  { %s5476_s30 = smov 0   ;;  %s6270_s0 = inlined_call_operand.vmem [shape: bf16[8,9,9,4], index: 0, kind: input, shape index: {}]   ;;  %s6271_s1 = inlined_call_operand.vmem [shape: bf16[16,4,8], index: 1, kind: input, shape index: {}]   ;;  %s6272_s2 = inlined_call_operand.vmem [shape: f32[1,8], index: 2, kind: input, shape index: {}]   ;;  %s6273_s3 = inlined_call_operand.vmem [shape: bf16[9,8,8], index: 3, kind: input, shape index: {}]   ;;  %s6274_s4 = inlined_call_operand.vmem [shape: f32[1,8], index: 4, kind: input, shape index: {}]   ;;  %s6275_s5 = inlined_call_operand.vmem [shape: bf16[9,8,8], index: 5, kind: input, shape index: {}]   ;;  %s6276_s6 = inlined_call_operand.vmem [shape: f32[1,8], index: 6, kind: input, shape index: {}]   ;;  %s6277_s7 = inlined_call_operand.vmem [shape: bf16[8,8], index: 7, kind: input, shape index: {}]   ;;  %s6278_s8 = inlined_call_operand.vmem [shape: f32[1,8], index: 8, kind: input, shape index: {}]   ;;  %s6279_s9 = inlined_call_operand.vmem [shape: f32[2,8,8,8], index: 9, kind: output, shape index: {}]  }
   0x1 LB: > { %s5482_s10 = sadd.s32 4294967295, %s5423_s30   ;;  %p4295_p0 = scmp.ge.s32.totalorder %s5423_s30, 1  ;;  %s5423_s30 = sphi %s5476_s30, %s19_s30  }
   0x2   : > { %p289_p1 = scmp.lt.s32.totalorder %s5423_s30, 3 }
   0x4   : > { %p290_p2 = pnand %p4295_p0, %p289_p1 }
   0x5   : > { %v4304_v0 = vld [vmem:[%s6271_s1 + $0x4] sm:$0x3] (!%p290_p2)  ;;  %vm448_vm0 = vcmask (!%p290_p2), 1041408   ;;  %s4296_s13 = sshll.u32 (!%p290_p2), %s5482_s10, 2  ;;  %v379_v2 = vld [vmem:[%s6271_s1] sm:$0x3] (!%p290_p2) }
   0x6   : > { %293 = sbr.rel (%p290_p2) target bundleno = 1213 (0x4bd), region = 56  ;;  %5339 = vmatprep.subr.msk.bf16.mxu0 (!%p290_p2), %vm448_vm0, %v4304_v0  ;;  %v450_v1 = vsel (!%p290_p2), %vm448_vm0, %v4304_v0, 0  ;;  %p327_p3 = scmp.lt.s32.totalorder (!%p290_p2), %s4296_s13, 7  ;;  %vm396_vm1 = vcmask (!%p290_p2), 1046528   ;;  %vm435_vm2 = vcmask (!%p290_p2), 31744   ;;  %v530_v46 = vsel (!%p290_p2), %vm448_vm0, %v379_v2, 0 }
   0x7   : > { %4740 = vmatpush3.bf16.msra.mxu0 (!%p290_p2), %v450_v1  ;;  %v4317_v53 = vld [vmem:[%s6271_s1 + $0x10] sm:$0x3] (!%p290_p2)  ;;  %vm2219_vm3 = vcmask (!%p290_p2), 64512   ;;  %vm2302_vm4 = vcmask (!%p290_p2), 58368   ;;  %vm2232_vm5 = vcmask (!%p290_p2), 1043456   ;;  %p333_p4 = scmp.lt.s32.totalorder (!%p290_p2), %s5482_s10, 1 }
   0x8   : > { %5340 = vmatprep.subr.msk.bf16.mxu0 (!%p290_p2), %vm448_vm0, %v379_v2 }
   0xd   : > { %s6281_s13 = smov (!%p327_p3, %s4296_s13), 7  ;;  %s6283_s10 = smov (!%p333_p4, %s5482_s10), 1 }
   0xe   : > { %s5375_s16 = smul.u32 72, %s6281_s13  ;;  %s4563_s18 = sshll.u32 %s6283_s10, 6 }
   0xf   : > { %s6244_s22 = scalar_lea.vmem %s6279_s9, %s4563_s18 }
  0x10   : > { %s5499_s19 = scalar_lea.vmem %s6270_s0, %s5375_s16 }
  0x11   : > { %v5502_v3 = vld [vmem:[%s5499_s19] sm:$0xf]  ;;  %v340_v4 = vld [vmem:[%s5499_s19 + $0x4] sm:$0x1]  ;;  %v5506_v5 = vld [vmem:[%s5499_s19 + $0x8] sm:$0xf] }
  0x12   : > { %v342_v6 = vld [vmem:[%s5499_s19 + $0xc] sm:$0x1]  ;;  %v5510_v7 = vld [vmem:[%s5499_s19 + $0x10] sm:$0xf]  ;;  %v344_v8 = vld [vmem:[%s5499_s19 + $0x14] sm:$0x1]  ;;  %v357_v9 = vunpack.c.l.bf16 %v5502_v3  ;;  %v358_v10 = vunpack.c.l.bf16 %v340_v4  ;;  %v359_v11 = vunpack.c.l.bf16 %v5506_v5  ;;  %v4300_v1 = vcombine.low %v5502_v3, %v5506_v5 }
  0x13   : > { %v5516_v12 = vld [vmem:[%s5499_s19 + $0x18] sm:$0xf]  ;;  %v346_v13 = vld [vmem:[%s5499_s19 + $0x1c] sm:$0x1]  ;;  %v5520_v14 = vld [vmem:[%s5499_s19 + $0x20] sm:$0xf]  ;;  %v360_v15 = vunpack.c.l.bf16 %v342_v6  ;;  %v361_v16 = vunpack.c.l.bf16 %v5510_v7  ;;  %v362_v17 = vunpack.c.l.bf16 %v344_v8 }
  0x14   : > { %v348_v18 = vld [vmem:[%s5499_s19 + $0x24] sm:$0x1]  ;;  %v363_v19 = vunpack.c.l.bf16 %v5516_v12  ;;  %v364_v20 = vunpack.c.l.bf16 %v346_v13  ;;  %v365_v21 = vunpack.c.l.bf16 %v5520_v14  ;;  %v397_v23 = vrot.slane %v357_v9, 1  ;;  %v5527_v26 = vld [vmem:[%s5499_s19 + $0x28] sm:$0xf] }
  0x15   : > { %v366_v22 = vunpack.c.l.bf16 %v348_v18  ;;  %v398_v24 = vrot.slane %v358_v10, 1  ;;  %v400_v25 = vrot.slane %v359_v11, 1  ;;  %v401_v27 = vrot.slane %v360_v15, 1  ;;  %v350_v31 = vld [vmem:[%s5499_s19 + $0x2c] sm:$0x1] }
  0x16   : > { %v403_v28 = vrot.slane %v361_v16, 1  ;;  %v404_v29 = vrot.slane %v362_v17, 1  ;;  %v406_v30 = vrot.slane %v363_v19, 1  ;;  %v407_v33 = vrot.slane %v364_v20, 1  ;;  %v351_v35 = vld [vmem:[%s5499_s19 + $0x30] sm:$0xf] }
  0x17   : > { %v399_v32 = vsel %vm396_vm1, %v397_v23, %v398_v24  ;;  %v409_v34 = vrot.slane %v365_v21, 1  ;;  %v352_v36 = vld [vmem:[%s5499_s19 + $0x34] sm:$0x1]  ;;  %v5534_v37 = vsel %vm396_vm1, %v400_v25, %v401_v27  ;;  %v410_v39 = vrot.slane %v366_v22, 1  ;;  %v353_v41 = vld [vmem:[%s5499_s19 + $0x38] sm:$0xf] }
  0x18   : > { %v405_v38 = vsel %vm396_vm1, %v403_v28, %v404_v29  ;;  %v367_v40 = vunpack.c.l.bf16 %v5527_v26  ;;  %v354_v42 = vld [vmem:[%s5499_s19 + $0x3c] sm:$0x1]  ;;  %v5541_v43 = vsel %vm396_vm1, %v406_v30, %v407_v33  ;;  %v429_v44 = vpack.c.bf16 %v5534_v37, %v399_v32  ;;  %v4322_v8 = vld [vmem:[%s6271_s1 + $0x14] sm:$0x3]  ;;  %v4349_v15 = vld [vmem:[%s6271_s1 + $0x2] sm:$0x3] }
  0x19   : > { %v430_v45 = vpack.c.bf16 %v5541_v43, %v405_v38  ;;  %v368_v47 = vunpack.c.l.bf16 %v350_v31  ;;  %v369_v49 = vunpack.c.l.bf16 %v351_v35  ;;  %v370_v50 = vunpack.c.l.bf16 %v352_v36  ;;  %v4354_v23 = vld [vmem:[%s6271_s1 + $0x6] sm:$0x3]  ;;  %v4327_v25 = vld [vmem:[%s5499_s19 + $0x48] sm:$0xf]  ;;  %v4328_v29 = vld [vmem:[%s5499_s19 + $0x4c] sm:$0x1] }
  0x1a   : > { %v412_v48 = vrot.slane %v367_v40, 1  ;;  %4741 = vmatprep.mubr.msk.bf16.mxu0 %vm435_vm2, %v429_v44  ;;  %v371_v51 = vunpack.c.l.bf16 %v353_v41  ;;  %v372_v52 = vunpack.c.l.bf16 %v354_v42  ;;  %v411_v54 = vsel %vm396_vm1, %v409_v34, %v410_v39  ;;  %v4330_v30 = vld [vmem:[%s5499_s19 + $0x54] sm:$0x1]  ;;  %v5610_v31 = vld [vmem:[%s5499_s19 + $0x58] sm:$0xf] }
  0x1b   : > { %4742 = vmatmul.mubr.msk.bf16.vlgmr.msra.gmra.mrb[0].mxu0 %vm435_vm2, %v430_v45  ;;  %v413_v55 = vrot.slane %v368_v47, 1  ;;  %v415_v56 = vrot.slane %v369_v49, 1  ;;  %v416_v57 = vrot.slane %v370_v50, 1  ;;  %v4301_v2 = vcombine.low %v5510_v7, %v5516_v12  ;;  %v5613_v32 = vld [vmem:[%s5499_s19 + $0x60] sm:$0xf] }
  0x1c   : > { %4750 = vmatpush3.bf16.msra.mxu0 %v530_v46  ;;  %v418_v58 = vrot.slane %v371_v51, 1  ;;  %v419_v59 = vrot.slane %v372_v52, 1  ;;  %v4302_v4 = vcombine.low %v5520_v14, %v5527_v26  ;;  %v616_v6 = vsel %vm448_vm0, %v4317_v53, 0  ;;  %v5620_v36 = vld [vmem:[%s5499_s19 + $0x70] sm:$0xf] }
  0x1d   : > { %v414_v60 = vsel %vm396_vm1, %v412_v48, %v413_v55  ;;  %5341 = vmatprep.subr.msk.bf16.mxu0 %vm448_vm0, %v4317_v53  ;;  %v417_v62 = vsel %vm396_vm1, %v415_v56, %v416_v57  ;;  %v4303_v3 = vcombine.low %v351_v35, %v353_v41  ;;  %v4313_v9 = vcombine.low %v5506_v5, %v5510_v7  ;;  %v355_v5 = vld [vmem:[%s5499_s19 + $0x40] sm:$0xf]  ;;  %v4332_v42 = vld [vmem:[%s5499_s19 + $0x5c] sm:$0x1]  ;;  %v4334_v47 = vld [vmem:[%s5499_s19 + $0x64] sm:$0x1] }
  0x1e   : > { %v431_v61 = vpack.c.bf16 %v414_v60, %v411_v54  ;;  %v420_v63 = vsel %vm396_vm1, %v418_v58, %v419_v59  ;;  %v4314_v10 = vcombine.low %v5516_v12, %v5520_v14  ;;  %v4315_v11 = vcombine.low %v5527_v26, %v351_v35  ;;  %v356_v12 = vld [vmem:[%s5499_s19 + $0x44] sm:$0x1]  ;;  %v5601_v26 = vld [vmem:[%s5499_s19 + $0x50] sm:$0xf]  ;;  %v5617_v35 = vld [vmem:[%s5499_s19 + $0x68] sm:$0xf] }
  0x1f   : > { %v432_v0 = vpack.c.bf16 %v420_v63, %v417_v62  ;;  %v716_v13 = vsel %vm448_vm0, %v4322_v8, 0  ;;  %v4316_v7 = vcombine.low %v353_v41, %v355_v5  ;;  %v697_v16 = vpack.c.bf16 %v405_v38, %v5534_v37  ;;  %v4363_v48 = vld [vmem:[%s6271_s1 + $0x12] sm:$0x3]  ;;  %v4336_v49 = vld [vmem:[%s5499_s19 + $0x6c] sm:$0x1] }
  0x20   : > { %4745 = vmatprep.mubr.msk.bf16.mxu0 %vm435_vm2, %v431_v61  ;;  %v373_v14 = vunpack.c.l.bf16 %v355_v5  ;;  %v374_v17 = vunpack.c.l.bf16 %v356_v12  ;;  %v698_v18 = vpack.c.bf16 %v411_v54, %v5541_v43  ;;  %v699_v20 = vpack.c.bf16 %v417_v62, %v414_v60  ;;  %v4338_v50 = vld [vmem:[%s5499_s19 + $0x74] sm:$0x1]  ;;  %v4339_v55 = vld [vmem:[%s5499_s19 + $0x78] sm:$0xf]  ;;  %v4341_v56 = vld [vmem:[%s5499_s19 + $0x80] sm:$0xf] }
  0x21   : > { %v847_v22 = vsel %vm448_vm0, %v4349_v15, 0  ;;  %v4345_v28 = vcombine.low %v4327_v25, %v5601_v26  ;;  %v810_v33 = vunpack.c.l.bf16 %v4327_v25  ;;  %v812_v34 = vunpack.c.l.bf16 %v5601_v26 }
  0x22   : > { %v693_v19 = vrot.slane %v373_v14, 1  ;;  %v694_v21 = vrot.slane %v374_v17, 1  ;;  %v811_v37 = vunpack.c.l.bf16 %v4328_v29  ;;  %v813_v38 = vunpack.c.l.bf16 %v4330_v30 }
  0x23   : > { %4746 = vmatmul.mubr.msk.bf16.gmra.mrb[4].mxu0 %vm435_vm2, %v432_v0  ;;  %v4346_v39 = vcombine.low %v5610_v31, %v5613_v32  ;;  %v989_v40 = vsel %vm448_vm0, %v4354_v23, 0  ;;  %v4347_v41 = vcombine.low %v5617_v35, %v5620_v36  ;;  %v938_v43 = vrot.slane %v810_v33, 1 }
  0x24   : > { %4751 = vmatprep.mubr.msk.bf16.mxu0 %vm435_vm2, %v4300_v1  ;;  %v695_v24 = vsel %vm396_vm1, %v693_v19, %v694_v21  ;;  %v941_v44 = vrot.slane %v812_v34, 1  ;;  %v939_v45 = vrot.slane %v811_v37, 1  ;;  %v942_v46 = vrot.slane %v813_v38, 1 }
  0x25   : > { %v700_v27 = vpack.c.bf16 %v695_v24, %v420_v63  ;;  %v814_v51 = vunpack.c.l.bf16 %v5610_v31  ;;  %v816_v52 = vunpack.c.l.bf16 %v5613_v32  ;;  %v818_v53 = vunpack.c.l.bf16 %v5617_v35 }
  0x26   : > { %v820_v54 = vunpack.c.l.bf16 %v5620_v36  ;;  %v815_v57 = vunpack.c.l.bf16 %v4332_v42  ;;  %v817_v58 = vunpack.c.l.bf16 %v4334_v47  ;;  %v940_v59 = vsel %vm396_vm1, %v938_v43, %v939_v45 }
  0x27   : > { %v943_v60 = vsel %vm396_vm1, %v941_v44, %v942_v46  ;;  %v819_v61 = vunpack.c.l.bf16 %v4336_v49  ;;  %v821_v62 = vunpack.c.l.bf16 %v4338_v50  ;;  %v944_v63 = vrot.slane %v814_v51, 1  ;;  %v4400_v46 = vld [vmem:[%s6271_s1 + $0xc] sm:$0x3]  ;;  %v5689_v49 = vld [vmem:[%s5499_s19 + $0x98] sm:$0xf] }
  0x28   : > { %v4348_v0 = vcombine.low %v4339_v55, %v4341_v56  ;;  %v947_v1 = vrot.slane %v816_v52, 1  ;;  %v824_v5 = vunpack.c.l.bf16 %v4341_v56  ;;  %v1083_v25 = vsel %vm448_vm0, %v4363_v48, 0  ;;  %v4374_v52 = vld [vmem:[%s5499_s19 + $0x94] sm:$0x1] }
  0x29   : > { %v4359_v33 = vcombine.low %v5601_v26, %v5610_v31  ;;  %v4360_v34 = vcombine.low %v5613_v32, %v5617_v35  ;;  %v4361_v37 = vcombine.low %v5620_v36, %v4339_v55  ;;  %v4343_v26 = vld [vmem:[%s5499_s19 + $0x88] sm:$0xf]  ;;  %v4344_v32 = vld [vmem:[%s5499_s19 + $0x8c] sm:$0x1] }
  0x2a   : > { %v959_v21 = vrot.slane %v824_v5, 1  ;;  %v4362_v31 = vcombine.low %v4341_v56, %v4343_v26  ;;  %v826_v35 = vunpack.c.l.bf16 %v4343_v26  ;;  %v827_v36 = vunpack.c.l.bf16 %v4344_v32  ;;  %v5701_v56 = vld [vmem:[%s5499_s19 + $0xa8] sm:$0xf] }
  0x2b   : > { %4752 = vmatmul.mubr.msk.bf16.vlgmr.msra.gmra.mrb[0].mxu0 %vm435_vm2, %v4301_v2  ;;  %v970_v2 = vpack.c.bf16 %v943_v60, %v940_v59  ;;  %v5708_v59 = vld [vmem:[%s5499_s19 + $0xb8] sm:$0xf] }
  0x2c   : > { %4760 = vmatpush3.bf16.msra.mxu0 %v616_v6  ;;  %4755 = vmatprep.mubr.msk.bf16.mxu0 %vm435_vm2, %v4302_v4  ;;  %v945_v4 = vrot.slane %v815_v57, 1  ;;  %v948_v6 = vrot.slane %v817_v58, 1  ;;  %v1160_v42 = vrot.slane %v826_v35, 1  ;;  %v1161_v44 = vrot.slane %v827_v36, 1  ;;  %v5705_v58 = vld [vmem:[%s5499_s19 + $0xb0] sm:$0xf] }
  0x2d   : > { %5342 = vmatprep.subr.msk.bf16.mxu0 %vm448_vm0, %v4322_v8  ;;  %v4340_v8 = vld [vmem:[%s5499_s19 + $0x7c] sm:$0x1]  ;;  %v1279_v57 = vunpack.c.l.bf16 %v5689_v49  ;;  %v1285_v5 = vunpack.c.l.bf16 %v5705_v58 }
  0x2e   : > { %v823_v12 = vunpack.c.l.bf16 %v4340_v8  ;;  %v1162_v47 = vsel %vm396_vm1, %v1160_v42, %v1161_v44 }
  0x33   : > { %4756 = vmatmul.mubr.msk.bf16.gmra.mrb[4].mxu0 %vm435_vm2, %v4303_v3  ;;  %v950_v3 = vrot.slane %v818_v53, 1  ;;  %v4376_v53 = vld [vmem:[%s5499_s19 + $0x9c] sm:$0x1] }
  0x34   : > { %4761 = vmatprep.mubr.msk.bf16.mxu0 %vm435_vm2, %v4313_v9  ;;  %v953_v9 = vrot.slane %v820_v54, 1 }
  0x3b   : > { %4762 = vmatmul.mubr.msk.bf16.vlgmr.msra.gmra.mrb[0].mxu0 %vm435_vm2, %v4314_v10  ;;  %v951_v10 = vrot.slane %v819_v61, 1  ;;  %v1280_v61 = vunpack.c.l.bf16 %v4376_v53 }
  0x3c   : > { %4770 = vmatpush3.bf16.msra.mxu0 %v716_v13  ;;  %4765 = vmatprep.mubr.msk.bf16.mxu0 %vm435_vm2, %v4315_v11  ;;  %v954_v11 = vrot.slane %v821_v62, 1  ;;  %v4342_v13 = vld [vmem:[%s5499_s19 + $0x84] sm:$0x1] }
  0x3d   : > { %5343 = vmatprep.subr.msk.bf16.mxu0 %vm448_vm0, %v4349_v15  ;;  %v822_v15 = vunpack.c.l.bf16 %v4339_v55  ;;  %v825_v14 = vunpack.c.l.bf16 %v4342_v13  ;;  %v952_v17 = vsel %vm396_vm1, %v950_v3, %v951_v10  ;;  %v5698_v55 = vld [vmem:[%s5499_s19 + $0xa0] sm:$0xf]  ;;  %v1409_v8 = vrot.slane %v1280_v61, 1  ;;  %v4380_v3 = vld [vmem:[%s5499_s19 + $0xac] sm:$0x1] }
  0x3e   : > { %v4392_v62 = vcombine.low %v5698_v55, %v5701_v56  ;;  %v4382_v10 = vld [vmem:[%s5499_s19 + $0xb4] sm:$0x1]  ;;  %v1281_v13 = vunpack.c.l.bf16 %v5698_v55 }
  0x3f   : > { %v956_v19 = vrot.slane %v822_v15, 1  ;;  %v960_v24 = vrot.slane %v825_v14, 1  ;;  %v1283_v15 = vunpack.c.l.bf16 %v5701_v56 }
  0x41   : > { %v961_v29 = vsel %vm396_vm1, %v959_v21, %v960_v24  ;;  %v1414_v24 = vrot.slane %v1283_v15, 1  ;;  %v4420_v15 = vld [vmem:[%s5499_s19 + $0xdc] sm:$0x1] }
  0x42   : > { %v1167_v50 = vpack.c.bf16 %v1162_v47, %v961_v29 }
  0x43   : > { %4766 = vmatmul.mubr.msk.bf16.gmra.mrb[4].mxu0 %vm435_vm2, %v4316_v7  ;;  %v946_v7 = vsel %vm396_vm1, %v944_v63, %v945_v4  ;;  %v1456_v4 = vsel %vm448_vm0, %v4400_v46, 0 }
  0x44   : > { %4771 = vmatprep.mubr.msk.bf16.mxu0 %vm435_vm2, %v697_v16  ;;  %v949_v16 = vsel %vm396_vm1, %v947_v1, %v948_v6  ;;  %v4378_v1 = vld [vmem:[%s5499_s19 + $0xa4] sm:$0x1] }
  0x45   : > { %v1282_v14 = vunpack.c.l.bf16 %v4378_v1 }
  0x4b   : > { %4772 = vmatmul.mubr.msk.bf16.vlgmr.msra.gmra.mrb[0].mxu0 %vm435_vm2, %v698_v18  ;;  %v955_v18 = vsel %vm396_vm1, %v953_v9, %v954_v11  ;;  %v4409_v9 = vld [vmem:[%s6271_s1 + $0x18] sm:$0x3]  ;;  %v4384_v11 = vld [vmem:[%s5499_s19 + $0xbc] sm:$0x1] }
  0x4c   : > { %4780 = vmatpush3.bf16.msra.mxu0 %v847_v22  ;;  %4775 = vmatprep.mubr.msk.bf16.mxu0 %vm435_vm2, %v699_v20  ;;  %v971_v20 = vpack.c.bf16 %v949_v16, %v946_v7  ;;  %v972_v22 = vpack.c.bf16 %v955_v18, %v952_v17  ;;  %v1288_v21 = vunpack.c.l.bf16 %v4384_v11 }
  0x4d   : > { %5344 = vmatprep.subr.msk.bf16.mxu0 %vm448_vm0, %v4354_v23  ;;  %v957_v23 = vrot.slane %v823_v12, 1  ;;  %v4387_v12 = vld [vmem:[%s5499_s19 + $0xc8] sm:$0xf] }
  0x4e   : > { %v1291_v26 = vunpack.c.l.bf16 %v4387_v12 }
  0x50   : > { %v1426_v44 = vrot.slane %v1291_v26, 1 }
  0x53   : > { %4776 = vmatmul.mubr.msk.bf16.gmra.mrb[4].mxu0 %vm435_vm2, %v700_v27  ;;  %v4368_v27 = vld [vmem:[%s6271_s1 + $0x16] sm:$0x3] }
  0x54   : > { %4781 = vmatprep.mubr.msk.bf16.mxu0 %vm435_vm2, %v4345_v28  ;;  %v958_v28 = vsel %vm396_vm1, %v956_v19, %v957_v23  ;;  %v1183_v38 = vsel %vm448_vm0, %v4368_v27, 0 }
  0x55   : > { %v973_v30 = vpack.c.bf16 %v961_v29, %v958_v28  ;;  %v1166_v43 = vpack.c.bf16 %v958_v28, %v955_v18  ;;  %v4386_v29 = vld [vmem:[%s5499_s19 + $0xc4] sm:$0x1] }
  0x56   : > { %v1290_v32 = vunpack.c.l.bf16 %v4386_v29  ;;  %v4424_v29 = vld [vmem:[%s5499_s19 + $0xec] sm:$0x1] }
  0x5b   : > { %4782 = vmatmul.mubr.msk.bf16.vlgmr.msra.gmra.mrb[0].mxu0 %vm435_vm2, %v4346_v39  ;;  %v4395_v39 = vld [vmem:[%s6271_s1 + $0x8] sm:$0x3] }
  0x5c   : > { %4790 = vmatpush3.bf16.msra.mxu0 %v989_v40  ;;  %4785 = vmatprep.mubr.msk.bf16.mxu0 %vm435_vm2, %v4347_v41  ;;  %v1164_v40 = vpack.c.bf16 %v946_v7, %v943_v60  ;;  %v1165_v41 = vpack.c.bf16 %v952_v17, %v949_v16  ;;  %v1314_v45 = vsel %vm448_vm0, %v4395_v39, 0  ;;  %v1278_v60 = vunpack.c.l.bf16 %v4374_v52  ;;  %v4385_v16 = vld [vmem:[%s5499_s19 + $0xc0] sm:$0xf] }
  0x5d   : > { %5345 = vmatprep.subr.msk.bf16.mxu0 %vm448_vm0, %v4363_v48  ;;  %v4373_v48 = vld [vmem:[%s5499_s19 + $0x90] sm:$0xf]  ;;  %v1287_v7 = vunpack.c.l.bf16 %v5708_v59  ;;  %v1284_v17 = vunpack.c.l.bf16 %v4380_v3  ;;  %v4394_v23 = vcombine.low %v4385_v16, %v4387_v12 }
  0x5e   : > { %v4391_v51 = vcombine.low %v4373_v48, %v5689_v49  ;;  %v1277_v54 = vunpack.c.l.bf16 %v4373_v48  ;;  %v1406_v6 = vrot.slane %v1278_v60, 1  ;;  %v1550_v48 = vsel %vm448_vm0, %v4409_v9, 0 }
  0x5f   : > { %v1415_v28 = vrot.slane %v1284_v17, 1  ;;  %v4407_v60 = vcombine.low %v5708_v59, %v4385_v16  ;;  %v5793_v17 = vld [vmem:[%s5499_s19 + $0xf8] sm:$0xf] }
  0x60   : > { %v1405_v63 = vrot.slane %v1277_v54, 1  ;;  %v4405_v54 = vcombine.low %v5689_v49, %v5698_v55  ;;  %v4389_v49 = vld [vmem:[%s5499_s19 + $0xd0] sm:$0xf]  ;;  %v1752_v26 = vunpack.c.l.bf16 %v5793_v17 }
  0x61   : > { %v4408_v55 = vcombine.low %v4387_v12, %v4389_v49  ;;  %v5787_v12 = vld [vmem:[%s5499_s19 + $0xe8] sm:$0xf] }
  0x62   : > { %v1407_v18 = vsel %vm396_vm1, %v1405_v63, %v1406_v6 }
  0x63   : > { %4786 = vmatmul.mubr.msk.bf16.gmra.mrb[4].mxu0 %vm435_vm2, %v4348_v0  ;;  %v4393_v0 = vcombine.low %v5705_v58, %v5708_v59 }
  0x64   : > { %4791 = vmatprep.mubr.msk.bf16.mxu0 %vm435_vm2, %v970_v2  ;;  %v1408_v2 = vrot.slane %v1279_v57, 1  ;;  %v4406_v57 = vcombine.low %v5701_v56, %v5705_v58  ;;  %v4390_v56 = vld [vmem:[%s5499_s19 + $0xd4] sm:$0x1]  ;;  %v1293_v58 = vunpack.c.l.bf16 %v4389_v49 }
  0x65   : > { %v1294_v59 = vunpack.c.l.bf16 %v4390_v56 }
  0x66   : > { %v1410_v19 = vsel %vm396_vm1, %v1408_v2, %v1409_v8  ;;  %v1627_v1 = vrot.slane %v1293_v58, 1  ;;  %v4446_v8 = vld [vmem:[%s6271_s1 + $0xe] sm:$0x3] }
  0x6b   : > { %4792 = vmatmul.mubr.msk.bf16.vlgmr.msra.gmra.mrb[0].mxu0 %vm435_vm2, %v971_v20  ;;  %v1286_v20 = vunpack.c.l.bf16 %v4382_v10  ;;  %v5777_v10 = vld [vmem:[%s5499_s19 + $0xe0] sm:$0xf] }
  0x6c   : > { %4800 = vmatpush3.bf16.msra.mxu0 %v1083_v25  ;;  %4795 = vmatprep.mubr.msk.bf16.mxu0 %vm435_vm2, %v972_v22  ;;  %v1411_v22 = vrot.slane %v1281_v13, 1  ;;  %v1437_v25 = vpack.c.bf16 %v1410_v19, %v1407_v18  ;;  %v5796_v18 = vld [vmem:[%s5499_s19 + $0x100] sm:$0xf] }
  0x6d   : > { %5346 = vmatprep.subr.msk.bf16.mxu0 %vm448_vm0, %v4368_v27  ;;  %v1412_v27 = vrot.slane %v1282_v14, 1  ;;  %v5790_v14 = vld [vmem:[%s5499_s19 + $0xf0] sm:$0xf] }
  0x73   : > { %4796 = vmatmul.mubr.msk.bf16.gmra.mrb[4].mxu0 %vm435_vm2, %v973_v30  ;;  %v1417_v30 = vrot.slane %v1285_v5, 1  ;;  %v4422_v5 = vld [vmem:[%s5499_s19 + $0xe4] sm:$0x1] }
  0x74   : > { %4801 = vmatprep.mubr.msk.bf16.mxu0 %vm435_vm2, %v4359_v33  ;;  %v1420_v33 = vrot.slane %v1287_v7, 1 }
  0x7b   : > { %4802 = vmatmul.mubr.msk.bf16.vlgmr.msra.gmra.mrb[0].mxu0 %vm435_vm2, %v4360_v34  ;;  %v1418_v34 = vrot.slane %v1286_v20, 1  ;;  %v1747_v20 = vunpack.c.l.bf16 %v4422_v5 }
  0x7c   : > { %4810 = vmatpush3.bf16.msra.mxu0 %v1183_v38  ;;  %4805 = vmatprep.mubr.msk.bf16.mxu0 %vm435_vm2, %v4361_v37  ;;  %v1421_v37 = vrot.slane %v1288_v21, 1  ;;  %v4388_v38 = vld [vmem:[%s5499_s19 + $0xcc] sm:$0x1]  ;;  %v4438_v21 = vcombine.low %v5787_v12, %v5790_v14 }
  0x7d   : > { %5347 = vmatprep.subr.msk.bf16.mxu0 %vm448_vm0, %v4395_v39  ;;  %v1289_v39 = vunpack.c.l.bf16 %v4385_v16  ;;  %v1292_v35 = vunpack.c.l.bf16 %v4388_v38  ;;  %v1419_v36 = vsel %vm396_vm1, %v1417_v30, %v1418_v34  ;;  %v1746_v16 = vunpack.c.l.bf16 %v5777_v10  ;;  %v4426_v30 = vld [vmem:[%s5499_s19 + $0xf4] sm:$0x1]  ;;  %v4428_v34 = vld [vmem:[%s5499_s19 + $0xfc] sm:$0x1] }
  0x7e   : > { %v1748_v38 = vunpack.c.l.bf16 %v5787_v12 }
  0x7f   : > { %v1423_v42 = vrot.slane %v1289_v39, 1  ;;  %v1427_v47 = vrot.slane %v1292_v35, 1  ;;  %v1750_v39 = vunpack.c.l.bf16 %v5790_v14  ;;  %v1749_v35 = vunpack.c.l.bf16 %v4424_v29 }
  0x80   : > { %v5425_v29 = vmov 0.0  }
  0x81   : > { %v1428_v52 = vsel %vm396_vm1, %v1426_v44, %v1427_v47  ;;  %v1884_v47 = vrot.slane %v1752_v26, 1  ;;  %2308 = vst.msk [vmem:[#allocation2 + $0x30] sm:$0xff] %vm2219_vm3, %v5425_v29  ;;  %2301 = vst.msk [vmem:[#allocation2] sm:$0xff] %vm2219_vm3, %v5425_v29 }
  0x82   : > { %2309 = vst.msk [vmem:[#allocation2 + $0x38] sm:$0x3] %vm2302_vm4, %v5425_v29  ;;  %2303 = vst.msk [vmem:[#allocation2 + $0x8] sm:$0x3] %vm2302_vm4, %v5425_v29 }
  0x83   : > { %4806 = vmatmul.mubr.msk.bf16.gmra.mrb[4].mxu0 %vm435_vm2, %v4362_v31  ;;  %v1413_v31 = vsel %vm396_vm1, %v1411_v22, %v1412_v27  ;;  %2304 = vst.msk [vmem:[#allocation2 + $0x10] sm:$0xff] %vm2219_vm3, %v5425_v29  ;;  %2306 = vst.msk [vmem:[#allocation2 + $0x20] sm:$0xff] %vm2219_vm3, %v5425_v29 }
  0x84   : > { %4811 = vmatprep.mubr.msk.bf16.mxu0 %vm435_vm2, %v1164_v40  ;;  %v1416_v40 = vsel %vm396_vm1, %v1414_v24, %v1415_v28  ;;  %v1631_v63 = vpack.c.bf16 %v1413_v31, %v1410_v19  ;;  %v1745_v19 = vunpack.c.l.bf16 %v4420_v15  ;;  %v1923_v24 = vsel %vm448_vm0, %v4446_v8, 0  ;;  %2305 = vst.msk [vmem:[#allocation2 + $0x18] sm:$0x3] %vm2302_vm4, %v5425_v29  ;;  %2307 = vst.msk [vmem:[#allocation2 + $0x28] sm:$0x3] %vm2302_vm4, %v5425_v29 }
  0x85   : > { %v1876_v28 = vrot.slane %v1747_v20, 1  ;;  %2310 = vst.msk [vmem:[#allocation2 + $0x40] sm:$0xff] %vm2219_vm3, %v5425_v29  ;;  %2312 = vst.msk [vmem:[#allocation2 + $0x50] sm:$0xff] %vm2219_vm3, %v5425_v29 }
  0x86   : > { %v1873_v27 = vrot.slane %v1745_v19, 1  ;;  %2311 = vst.msk [vmem:[#allocation2 + $0x48] sm:$0x3] %vm2302_vm4, %v5425_v29  ;;  %2313 = vst.msk [vmem:[#allocation2 + $0x58] sm:$0x3] %vm2302_vm4, %v5425_v29 }
  0x87   : > { %2314 = vst.msk [vmem:[#allocation2 + $0x60] sm:$0xff] %vm2219_vm3, %v5425_v29  ;;  %2316 = vst.msk [vmem:[#allocation2 + $0x70] sm:$0xff] %vm2219_vm3, %v5425_v29 }
  0x88   : > { %2315 = vst.msk [vmem:[#allocation2 + $0x68] sm:$0x3] %vm2302_vm4, %v5425_v29  ;;  %2317 = vst.msk [vmem:[#allocation2 + $0x78] sm:$0x3] %vm2302_vm4, %v5425_v29 }
  0x89   : > { %2318 = vst.msk [vmem:[#allocation2 + $0x80] sm:$0xff] %vm2219_vm3, %v5425_v29  ;;  %2320 = vst.msk [vmem:[#allocation2 + $0x90] sm:$0xff] %vm2219_vm3, %v5425_v29 }
  0x8a   : > { %2319 = vst.msk [vmem:[#allocation2 + $0x88] sm:$0x3] %vm2302_vm4, %v5425_v29  ;;  %2321 = vst.msk [vmem:[#allocation2 + $0x98] sm:$0x3] %vm2302_vm4, %v5425_v29 }
  0x8b   : > { %4812 = vmatmul.mubr.msk.bf16.vlgmr.msra.gmra.mrb[0].mxu0 %vm435_vm2, %v1165_v41  ;;  %v1422_v41 = vsel %vm396_vm1, %v1420_v33, %v1421_v37  ;;  %v4455_v33 = vld [vmem:[%s6271_s1 + $0x1a] sm:$0x3]  ;;  %v4430_v37 = vld [vmem:[%s5499_s19 + $0x104] sm:$0x1] }
  0x8c   : > { %4820 = vmatpush3.bf16.msra.mxu0 %v1314_v45  ;;  %4815 = vmatprep.mubr.msk.bf16.mxu0 %vm435_vm2, %v1166_v43  ;;  %v1438_v43 = vpack.c.bf16 %v1416_v40, %v1413_v31  ;;  %v1439_v45 = vpack.c.bf16 %v1422_v41, %v1419_v36  ;;  %v1754_v31 = vunpack.c.l.bf16 %v5796_v18  ;;  %v1755_v44 = vunpack.c.l.bf16 %v4430_v37 }
  0x8d   : > { %5348 = vmatprep.subr.msk.bf16.mxu0 %vm448_vm0, %v4400_v46  ;;  %v1424_v46 = vrot.slane %v1290_v32, 1  ;;  %v4433_v32 = vld [vmem:[%s5499_s19 + $0x110] sm:$0xf] }
  0x8e   : > { %v1758_v49 = vunpack.c.l.bf16 %v4433_v32 }
  0x93   : > { %4816 = vmatmul.mubr.msk.bf16.gmra.mrb[4].mxu0 %vm435_vm2, %v1167_v50  ;;  %v4414_v50 = vld [vmem:[%s6271_s1 + $0x1c] sm:$0x3] }
  0x94   : > { %4821 = vmatprep.mubr.msk.bf16.mxu0 %vm435_vm2, %v4391_v51  ;;  %v1425_v51 = vsel %vm396_vm1, %v1423_v42, %v1424_v46  ;;  %v1650_v61 = vsel %vm448_vm0, %v4414_v50, 0  ;;  %v1881_v46 = vrot.slane %v1750_v39, 1  ;;  %v4465_v39 = vld [vmem:[%s6272_s2] ss:$0 sm:$0xff] }
  0x95   : > { %v1440_v53 = vpack.c.bf16 %v1428_v52, %v1425_v51  ;;  %v1633_v2 = vpack.c.bf16 %v1425_v51, %v1422_v41 }
  0x9b   : > { %4822 = vmatmul.mubr.msk.bf16.vlgmr.msra.gmra.mrb[0].mxu0 %vm435_vm2, %v4392_v62  ;;  %v4441_v62 = vld [vmem:[%s6271_s1 + $0xa] sm:$0x3] }
  0x9c   : > { %4830 = vmatpush3.bf16.msra.mxu0 %v1456_v4  ;;  %4825 = vmatprep.mubr.msk.bf16.mxu0 %vm435_vm2, %v4393_v0  ;;  %v1632_v0 = vpack.c.bf16 %v1419_v36, %v1416_v40  ;;  %v1628_v4 = vrot.slane %v1294_v59, 1  ;;  %v1781_v6 = vsel %vm448_vm0, %v4441_v62, 0  ;;  %v4431_v40 = vld [vmem:[%s5499_s19 + $0x108] sm:$0xf]  ;;  %v1751_v36 = vunpack.c.l.bf16 %v4426_v30  ;;  %v2211_v30 = vld [vmem:[%s6277_s7] sm:$0xf] }
  0x9d   : > { %5349 = vmatprep.subr.msk.bf16.mxu0 %vm448_vm0, %v4409_v9  ;;  %v4419_v9 = vld [vmem:[%s5499_s19 + $0xd8] sm:$0xf]  ;;  %v4453_v19 = vcombine.low %v5796_v18, %v4431_v40 }
  0x9e   : > { %v1629_v3 = vsel %vm396_vm1, %v1627_v1, %v1628_v4  ;;  %v4437_v13 = vcombine.low %v4419_v9, %v5777_v10  ;;  %v1744_v7 = vunpack.c.l.bf16 %v4419_v9  ;;  %v1893_v4 = vrot.slane %v1758_v49, 1 }
  0x9f   : > { %v1634_v11 = vpack.c.bf16 %v1629_v3, %v1428_v52  ;;  %v1879_v52 = vrot.slane %v1749_v35, 1  ;;  %v2017_v9 = vsel %vm448_vm0, %v4455_v33, 0 }
  0xa0   : > { %v1872_v22 = vrot.slane %v1744_v7, 1  ;;  %v4451_v7 = vcombine.low %v5777_v10, %v5787_v12  ;;  %v4436_v10 = vld [vmem:[%s5499_s19 + $0x11c] sm:$0x1] }
  0xa2   : > { %v1874_v41 = vsel %vm396_vm1, %v1872_v22, %v1873_v27 }
  0xa3   : > { %4826 = vmatmul.mubr.msk.bf16.gmra.mrb[4].mxu0 %vm435_vm2, %v4394_v23  ;;  %v1875_v23 = vrot.slane %v1746_v16, 1  ;;  %v4452_v16 = vcombine.low %v5790_v14, %v5793_v17 }
  0xa4   : > { %4831 = vmatprep.mubr.msk.bf16.mxu0 %vm435_vm2, %v1437_v25  ;;  %v4439_v25 = vcombine.low %v5793_v17, %v5796_v18 }
  0xa5   : > { %v1877_v42 = vsel %vm396_vm1, %v1875_v23, %v1876_v28 }
  0xa6   : > { %v1904_v51 = vpack.c.bf16 %v1877_v42, %v1874_v41 }
  0xab   : > { %4832 = vmatmul.mubr.msk.bf16.vlgmr.msra.gmra.mrb[0].mxu0 %vm435_vm2, %v1438_v43  ;;  %v1753_v43 = vunpack.c.l.bf16 %v4428_v34  ;;  %v4471_v34 = vld [vmem:[%s6273_s3 + $0x4] sm:$0xf] }
  0xac   : > { %4840 = vmatpush3.bf16.msra.mxu0 %v1550_v48  ;;  %4835 = vmatprep.mubr.msk.bf16.mxu0 %vm435_vm2, %v1439_v45  ;;  %v1878_v45 = vrot.slane %v1748_v38, 1  ;;  %v4440_v48 = vcombine.low %v4431_v40, %v4433_v32  ;;  %v2371_v37 = vsel %vm2232_vm5, %v4471_v34, 0  ;;  %v2343_v38 = vld [vmem:[%s6273_s3] sm:$0xf] }
  0xad   : > { %5350 = vmatprep.subr.msk.bf16.mxu0 %vm448_vm0, %v4414_v50  ;;  %v1887_v50 = vrot.slane %v1754_v31, 1  ;;  %5357 = vmatprep.subr.msk.bf16.mxu1 %vm2232_vm5, %v4471_v34 }
  0xae   : > { %5090 = vmatpush3.bf16.msra.mxu1 %v2371_v37 }
  0xaf   : > { %5358 = vmatprep.subr.msk.bf16.mxu1 %vm2232_vm5, %v2343_v38 }
  0xb3   : > { %4836 = vmatmul.mubr.msk.bf16.gmra.mrb[4].mxu0 %vm435_vm2, %v1440_v53  ;;  %v1882_v53 = vrot.slane %v1751_v36, 1 }
  0xb4   : > { %4841 = vmatprep.mubr.msk.bf16.mxu0 %vm435_vm2, %v4405_v54  ;;  %v1885_v54 = vrot.slane %v1753_v43, 1 }
  0xb6   : > { %v1886_v59 = vsel %vm396_vm1, %v1884_v47, %v1885_v54 }
  0xbb   : > { %4842 = vmatmul.mubr.msk.bf16.vlgmr.msra.gmra.mrb[0].mxu0 %vm435_vm2, %v4406_v57  ;;  %v1888_v57 = vrot.slane %v1755_v44, 1 }
  0xbc   : > { %4850 = vmatpush3.bf16.msra.mxu0 %v1650_v61  ;;  %4845 = vmatprep.mubr.msk.bf16.mxu0 %vm435_vm2, %v4407_v60  ;;  %v4432_v60 = vld [vmem:[%s5499_s19 + $0x10c] sm:$0x1]  ;;  %v4434_v61 = vld [vmem:[%s5499_s19 + $0x114] sm:$0x1] }
  0xbd   : > { %5351 = vmatprep.subr.msk.bf16.mxu0 %vm448_vm0, %v4441_v62  ;;  %v1756_v62 = vunpack.c.l.bf16 %v4431_v40  ;;  %v1757_v56 = vunpack.c.l.bf16 %v4432_v60  ;;  %v1759_v58 = vunpack.c.l.bf16 %v4434_v61 }
  0xbf   : > { %v1890_v1 = vrot.slane %v1756_v62, 1  ;;  %v1894_v3 = vrot.slane %v1759_v58, 1  ;;  %v5923_v58 = vld [vmem:[#allocation2] sm:$0xff] }
  0xc1   : > { %v1895_v15 = vsel %vm396_vm1, %v1893_v4, %v1894_v3  ;;  %v2451_v4 = vsel %vm2232_vm5, %v2343_v38, 0  ;;  %v4480_v3 = vld [vmem:[%s6273_s3 + $0x8] sm:$0xf] }
  0xc3   : > { %4846 = vmatmul.mubr.msk.bf16.gmra.mrb[4].mxu0 %vm435_vm2, %v4408_v55  ;;  %v1880_v55 = vsel %vm396_vm1, %v1878_v45, %v1879_v52 }
  0xc4   : > { %4851 = vmatprep.mubr.msk.bf16.mxu0 %vm435_vm2, %v1631_v63  ;;  %v1883_v63 = vsel %vm396_vm1, %v1881_v46, %v1882_v53  ;;  %v2098_v23 = vpack.c.bf16 %v1880_v55, %v1877_v42 }
  0xc5   : > { %v2099_v14 = vpack.c.bf16 %v1886_v59, %v1883_v63 }
  0xcb   : > { %4852 = vmatmul.mubr.msk.bf16.vlgmr.msra.gmra.mrb[0].mxu0 %vm435_vm2, %v1632_v0  ;;  %v1889_v0 = vsel %vm396_vm1, %v1887_v50, %v1888_v57  ;;  %v5903_v57 = vld [vmem:[#allocation2 + $0x1] sm:$0xff] }
  0xcc   : > { %4860 = vmatpush3.bf16.msra.mxu0 %v1781_v6  ;;  %4855 = vmatprep.mubr.msk.bf16.mxu0 %vm435_vm2, %v1633_v2  ;;  %v1905_v2 = vpack.c.bf16 %v1883_v63, %v1880_v55  ;;  %v1906_v6 = vpack.c.bf16 %v1889_v0, %v1886_v59 }
  0xcd   : > { %5352 = vmatprep.subr.msk.bf16.mxu0 %vm448_vm0, %v4446_v8  ;;  %v1891_v8 = vrot.slane %v1757_v56, 1 }
  0xd3   : > { %4856 = vmatmul.mubr.msk.bf16.gmra.mrb[4].mxu0 %vm435_vm2, %v1634_v11  ;;  %v4460_v11 = vld [vmem:[%s6271_s1 + $0x1e] sm:$0x3] }
  0xd4   : > { %4861 = vmatprep.mubr.msk.bf16.mxu0 %vm435_vm2, %v4437_v13  ;;  %v1892_v13 = vsel %vm396_vm1, %v1890_v1, %v1891_v8  ;;  %v2117_v20 = vsel %vm448_vm0, %v4460_v11, 0 }
  0xd5   : > { %v1907_v5 = vpack.c.bf16 %v1895_v15, %v1892_v13  ;;  %v2100_v18 = vpack.c.bf16 %v1892_v13, %v1889_v0 }
  0xdb   : > { %4862 = vmatmul.mubr.msk.bf16.vlgmr.msra.gmra.mrb[0].mxu0 %vm435_vm2, %v4438_v21  ;;  %v4435_v21 = vld [vmem:[%s5499_s19 + $0x118] sm:$0xf] }
  0xdc   : > { %4870 = vmatpush3.bf16.msra.mxu0 %v1923_v24  ;;  %4865 = vmatprep.mubr.msk.bf16.mxu0 %vm435_vm2, %v4439_v25  ;;  %v4454_v22 = vcombine.low %v4433_v32, %v4435_v21  ;;  %v1760_v12 = vunpack.c.l.bf16 %v4435_v21  ;;  %v1761_v24 = vunpack.c.l.bf16 %v4436_v10 }
  0xdd   : > { %5353 = vmatprep.subr.msk.bf16.mxu0 %vm448_vm0, %v4455_v33  ;;  %v2234_v33 = vsel %vm2232_vm5, %v2211_v30, 0 }
  0xde   : > { %v2094_v17 = vrot.slane %v1760_v12, 1  ;;  %v2095_v25 = vrot.slane %v1761_v24, 1 }
  0xe0   : > { %v2096_v27 = vsel %vm396_vm1, %v2094_v17, %v2095_v25 }
  0xe1   : > { %v2101_v28 = vpack.c.bf16 %v2096_v27, %v1895_v15 }
  0xe3   : > { %4866 = vmatmul.mubr.msk.bf16.gmra.mrb[4].mxu0 %vm435_vm2, %v4440_v48 }
  0xe4   : > { %4871 = vmatprep.mubr.msk.bf16.mxu0 %vm435_vm2, %v1904_v51 }
  0xeb   : > { %4872 = vmatmul.mubr.msk.bf16.vlgmr.msra.gmra.mrb[0].mxu0 %vm435_vm2, %v1905_v2 }
  0xec   : > { %4880 = vmatpush3.bf16.msra.mxu0 %v2017_v9  ;;  %4875 = vmatprep.mubr.msk.bf16.mxu0 %vm435_vm2, %v1906_v6 }
  0xed   : > { %5354 = vmatprep.subr.msk.bf16.mxu0 %vm448_vm0, %v4460_v11 }
  0xf3   : > { %4876 = vmatmul.mubr.msk.bf16.gmra.mrb[4].mxu0 %vm435_vm2, %v1907_v5 }
  0xf4   : > { %4881 = vmatprep.mubr.msk.bf16.mxu0 %vm435_vm2, %v4451_v7  ;;  %v2545_v7 = vsel %vm2232_vm5, %v4480_v3, 0 }
  0xfb   : > { %4882 = vmatmul.mubr.msk.bf16.vlgmr.msra.gmra.mrb[0].mxu0 %vm435_vm2, %v4452_v16 }
  0xfc   : > { %4890 = vmatpush3.bf16.msra.mxu0 %v2117_v20  ;;  %4885 = vmatprep.mubr.msk.bf16.mxu0 %vm435_vm2, %v4453_v19  ;;  %v4485_v20 = vld [vmem:[%s6273_s3 + $0xc] sm:$0xf] }
  0xfd   : > { %5355 = vmatprep.subr.msk.bf16.mxu0 %vm2232_vm5, %v2211_v30  ;;  %v2647_v27 = vsel %vm2232_vm5, %v4485_v20, 0  ;;  %v4490_v30 = vld [vmem:[%s6273_s3 + $0x10] sm:$0xf] }
 0x103   : > { %4886 = vmatmul.mubr.msk.bf16.gmra.mrb[4].mxu0 %vm435_vm2, %v4454_v22  ;;  %v5965_v22 = vld [vmem:[#allocation2 + $0x2] sm:$0xff] }
 0x104   : > { %4891 = vmatprep.mubr.msk.bf16.mxu0 %vm435_vm2, %v2098_v23 }
 0x10b   : > { %4892 = vmatmul.mubr.msk.bf16.vlgmr.msra.gmra.mrb[0].mxu0 %vm435_vm2, %v2099_v14 }
 0x10c   : > { %4895 = vmatprep.mubr.msk.bf16.mxu0 %vm435_vm2, %v2100_v18  ;;  %4900 = vmatpush3.bf16.msra.mxu0 %v2234_v33 }
 0x10d   : > { %5356 = vmatprep.subr.msk.bf16.mxu0 %vm2232_vm5, %v4471_v34 }
 0x113   : > { %4896 = vmatmul.mubr.msk.bf16.gmra.mrb[4].mxu0 %vm435_vm2, %v2101_v28 }
 0x1de   : > { %v4893_v26 = vpop.f32.mrb[0].mxu0 }
 0x1df   : > { %v2201_v31 = vadd.f32 %v4893_v26, %v4465_v39  ;;  %v2153_v40 = vpop.f32.mrb[1].mxu0  ;;  %v2749_v26 = vsel %vm2232_vm5, %v4490_v30, 0 }
 0x1e0   : > { %v2199_v32 = vadd.f32 %v4465_v39, %v2153_v40  ;;  %v4894_v35 = vpop.f32.mrb[2].mxu0  ;;  %v4495_v40 = vld [vmem:[%s6273_s3 + $0x14] sm:$0xf] }
 0x1e1   : > { %2325 = vst.msk [vmem:[#allocation2 + $0x31] sm:$0xff] %vm2219_vm3, %v2201_v31  ;;  %v2202_v36 = vadd.f32 %v4894_v35, %v4465_v39  ;;  %v2156_v41 = vpop.f32.mrb[3].mxu0 }
 0x1e2   : > { %2323 = vst.msk [vmem:[#allocation2 + $0x11] sm:$0xff] %vm2219_vm3, %v2199_v32  ;;  %v2200_v42 = vadd.f32 %v4465_v39, %v2156_v41 }
 0x1e3   : > { %v2208_v43 = vpack.c.bf16 %v2202_v36, %v2201_v31  ;;  %2326 = vst.msk [vmem:[#allocation2 + $0x41] sm:$0xff] %vm2219_vm3, %v2202_v36 }
 0x1e4   : > { %v2207_v44 = vpack.c.bf16 %v2200_v42, %v2199_v32  ;;  %2324 = vst.msk [vmem:[#allocation2 + $0x21] sm:$0xff] %vm2219_vm3, %v2200_v42  ;;  %v2851_v42 = vsel %vm2232_vm5, %v4495_v40, 0 }
 0x1e6   : > { %v4897_v45 = vpop.f32.mrb[4].mxu0  ;;  %4901 = vmatprep.mubr.msk.bf16.mxu0 %vm2219_vm3, %v2207_v44  ;;  %v4500_v44 = vld [vmem:[%s6273_s3 + $0x18] sm:$0xf] }
 0x1e7   : > { %v2205_v46 = vadd.f32 %v4897_v45, %v4465_v39  ;;  %v2169_v47 = vpop.f32.mrb[5].mxu0  ;;  %4902 = vmatmul.mubr.msk.bf16.vlgmr.msra.gmra.mrb[8].mxu0 %vm2219_vm3, %v2208_v43 }
 0x1e8   : > { %v2203_v48 = vadd.f32 %v4465_v39, %v2169_v47  ;;  %v4898_v50 = vpop.f32.mrb[6].mxu0  ;;  %4910 = vmatpush3.bf16.msra.mxu0 %v2371_v37  ;;  %v5936_v6 = vld [vmem:[#allocation2 + $0x31] sm:$0xff] }
 0x1e9   : > { %2329 = vst.msk [vmem:[#allocation2 + $0x71] sm:$0xff] %vm2219_vm3, %v2205_v46  ;;  %v2206_v51 = vadd.f32 %v4898_v50, %v4465_v39  ;;  %v2172_v52 = vpop.f32.mrb[7].mxu0  ;;  %v5905_v60 = vld [vmem:[#allocation2 + $0x11] sm:$0xff]  ;;  %v2954_v50 = vsel %vm2232_vm5, %v4500_v44, 0 }
 0x1ea   : > { %2327 = vst.msk [vmem:[#allocation2 + $0x51] sm:$0xff] %vm2219_vm3, %v2203_v48  ;;  %v2204_v53 = vadd.f32 %v4465_v39, %v2172_v52  ;;  %v2352_v62 = vpack.c.bf16 %v5905_v60, %v5903_v57  ;;  %v5913_v49 = vld [vmem:[#allocation2 + $0x41] sm:$0xff]  ;;  %v2332_v1 = vld [vmem:[#allocation2 + $0x10] sm:$0xff]  ;;  %v4505_v52 = vld [vmem:[%s6273_s3 + $0x1c] sm:$0xf] }
 0x1eb   : > { %v2210_v54 = vpack.c.bf16 %v2206_v51, %v2205_v46  ;;  %2330 = vst.msk [vmem:[#allocation2 + $0x81] sm:$0xff] %vm2219_vm3, %v2206_v51  ;;  %v5921_v56 = vld [vmem:[#allocation2 + $0x21] sm:$0xff]  ;;  %v2339_v9 = vpack.c.bf16 %v2332_v1, %v5923_v58  ;;  %v2334_v15 = vld [vmem:[#allocation2 + $0x30] sm:$0xff]  ;;  %v2731_v41 = vpack.c.bf16 %v5913_v49, %v5936_v6 }
 0x1ec   : > { %v2209_v61 = vpack.c.bf16 %v2204_v53, %v2203_v48  ;;  %2328 = vst.msk [vmem:[#allocation2 + $0x61] sm:$0xff] %vm2219_vm3, %v2204_v53  ;;  %v5940_v8 = vpack.c.bf16 %v5936_v6, %v5921_v56  ;;  %v2333_v11 = vld [vmem:[#allocation2 + $0x20] sm:$0xff]  ;;  %v2519_v23 = vld [vmem:[#allocation2 + $0x12] sm:$0xff]  ;;  %v2730_v36 = vpack.c.bf16 %v5921_v56, %v5905_v60  ;;  %v3056_v60 = vsel %vm2232_vm5, %v4505_v52, 0 }
 0x1ed   : > { %v5952_v5 = vpack.c.bf16 %v2334_v15, %v2333_v11  ;;  %v2335_v16 = vld [vmem:[#allocation2 + $0x40] sm:$0xff]  ;;  %v2526_v24 = vpack.c.bf16 %v2519_v23, %v5965_v22  ;;  %v2521_v18 = vld [vmem:[#allocation2 + $0x32] sm:$0xff]  ;;  %v2628_v38 = vpack.c.bf16 %v2333_v11, %v2332_v1 }
 0x1ee   : > { %4905 = vmatprep.mubr.msk.bf16.mxu0 %vm2219_vm3, %v2209_v61  ;;  %v2520_v14 = vld [vmem:[#allocation2 + $0x22] sm:$0xff]  ;;  %v2629_v39 = vpack.c.bf16 %v2335_v16, %v2334_v15  ;;  %v6043_v56 = vld [vmem:[#allocation2 + $0x91] sm:$0xff] }
 0x1ef   : > { %4906 = vmatmul.mubr.msk.bf16.gmra.mrb[12].mxu0 %vm2219_vm3, %v2210_v54  ;;  %v5973_v25 = vpack.c.bf16 %v2521_v18, %v2520_v14  ;;  %v2522_v28 = vld [vmem:[#allocation2 + $0x42] sm:$0xff]  ;;  %v2832_v47 = vpack.c.bf16 %v2520_v14, %v2519_v23  ;;  %v4515_v23 = vld [vmem:[%s6274_s4] ss:$0 sm:$0xff] }
 0x1f0   : > { %4911 = vmatprep.mubr.msk.bf16.mxu0 %vm2219_vm3, %v2352_v62  ;;  %v5927_v0 = vld [vmem:[#allocation2 + $0x71] sm:$0xff]  ;;  %v2833_v48 = vpack.c.bf16 %v2522_v28, %v2521_v18  ;;  %v4510_v61 = vld [vmem:[%s6273_s3 + $0x20] sm:$0xf] }
 0x1f1   : > { %v5915_v55 = vld [vmem:[#allocation2 + $0x51] sm:$0xff] }
 0x1f2   : > { %v5919_v63 = vpack.c.bf16 %v5915_v55, %v5913_v49  ;;  %v2336_v13 = vld [vmem:[#allocation2 + $0x50] sm:$0xff]  ;;  %v2627_v32 = vld [vmem:[#allocation2 + $0x80] sm:$0xff] }
 0x1f3   : > { %v5925_v59 = vld [vmem:[#allocation2 + $0x61] sm:$0xff]  ;;  %v5955_v19 = vpack.c.bf16 %v2336_v13, %v2335_v16  ;;  %v2338_v10 = vld [vmem:[#allocation2 + $0x70] sm:$0xff] }
 0x1f4   : > { %4915 = vmatprep.mubr.msk.bf16.mxu1 %vm2219_vm3, %v5919_v63  ;;  %v5933_v2 = vpack.c.bf16 %v5927_v0, %v5925_v59  ;;  %v2337_v21 = vld [vmem:[#allocation2 + $0x60] sm:$0xff]  ;;  %v2523_v17 = vld [vmem:[#allocation2 + $0x52] sm:$0xff]  ;;  %v2631_v35 = vpack.c.bf16 %v2627_v32, %v2338_v10  ;;  %v2732_v43 = vpack.c.bf16 %v5925_v59, %v5915_v55  ;;  %v3158_v55 = vsel %vm2232_vm5, %v4510_v61, 0 }
 0x1f5   : > { %v5967_v12 = vpack.c.bf16 %v2338_v10, %v2337_v21  ;;  %v5976_v29 = vpack.c.bf16 %v2523_v17, %v2522_v28  ;;  %v2524_v33 = vld [vmem:[#allocation2 + $0x62] sm:$0xff]  ;;  %v2525_v34 = vld [vmem:[#allocation2 + $0x72] sm:$0xff]  ;;  %v2630_v31 = vpack.c.bf16 %v2337_v21, %v2336_v13 }
 0x1f6   : > { %4916 = vmatmul.mubr.msk.bf16.vlgmr.msra.gmra.mrb[0].mxu1 %vm2219_vm3, %v5933_v2  ;;  %v2529_v37 = vpack.c.bf16 %v2525_v34, %v2524_v33  ;;  %v2729_v45 = vld [vmem:[#allocation2 + $0x81] sm:$0xff]  ;;  %v2834_v51 = vpack.c.bf16 %v2524_v33, %v2523_v17  ;;  %v6032_v62 = vld [vmem:[#allocation2 + $0x90] sm:$0xff] }
 0x1f7   : > { %4920 = vmatpush3.bf16.msra.mxu1 %v2451_v4  ;;  %4912 = vmatmul.mubr.msk.bf16.vlgmr.msra.gmra.mrb[16].mxu0 %vm2219_vm3, %v5940_v8  ;;  %v2733_v46 = vpack.c.bf16 %v2729_v45, %v5927_v0  ;;  %v2831_v53 = vld [vmem:[#allocation2 + $0x82] sm:$0xff]  ;;  %v2938_v49 = vpack.c.bf16 %v6032_v62, %v2627_v32  ;;  %v3040_v59 = vpack.c.bf16 %v6043_v56, %v2729_v45  ;;  %v6052_v0 = vld [vmem:[#allocation2 + $0x92] sm:$0xff] }
 0x1f8   : > { %4921 = vmatprep.mubr.msk.bf16.mxu1 %vm2219_vm3, %v2339_v9  ;;  %5359 = vmatprep.subr.msk.bf16.mxu1 %vm2232_vm5, %v4480_v3  ;;  %v2835_v54 = vpack.c.bf16 %v2831_v53, %v2525_v34 }
 0x1fe   : > { %4922 = vmatmul.mubr.msk.bf16.vlgmr.msra.gmra.mrb[4].mxu1 %vm2219_vm3, %v5952_v5 }
 0x1ff   : > { %4930 = vmatpush3.bf16.msra.mxu1 %v2545_v7  ;;  %4925 = vmatprep.mubr.msk.bf16.mxu1 %vm2219_vm3, %v5955_v19  ;;  %v4516_v7 = vld [vmem:[%s6275_s5 + $0x4] sm:$0xf] }
 0x200   : > { %5360 = vmatprep.subr.msk.bf16.mxu1 %vm2232_vm5, %v4485_v20  ;;  %v3292_v20 = vld [vmem:[%s6275_s5] sm:$0xf] }
 0x206   : > { %4926 = vmatmul.mubr.msk.bf16.gmra.mrb[0].mxu1 %vm2219_vm3, %v5967_v12 }
 0x207   : > { %4931 = vmatprep.mubr.msk.bf16.mxu1 %vm2219_vm3, %v2526_v24 }
 0x20e   : > { %4932 = vmatmul.mubr.msk.bf16.vlgmr.msra.gmra.mrb[4].mxu1 %vm2219_vm3, %v5973_v25 }
 0x20f   : > { %4940 = vmatpush3.bf16.msra.mxu1 %v2647_v27  ;;  %4935 = vmatprep.mubr.msk.bf16.mxu1 %vm2219_vm3, %v5976_v29 }
 0x210   : > { %5361 = vmatprep.subr.msk.bf16.mxu1 %vm2232_vm5, %v4490_v30 }
 0x216   : > { %4936 = vmatmul.mubr.msk.bf16.gmra.mrb[0].mxu1 %vm2219_vm3, %v2529_v37 }
 0x217   : > { %4941 = vmatprep.mubr.msk.bf16.mxu1 %vm2219_vm3, %v2628_v38 }
 0x21e   : > { %4942 = vmatmul.mubr.msk.bf16.vlgmr.msra.gmra.mrb[4].mxu1 %vm2219_vm3, %v2629_v39 }
 0x21f   : > { %4950 = vmatpush3.bf16.msra.mxu1 %v2749_v26  ;;  %4945 = vmatprep.mubr.msk.bf16.mxu1 %vm2219_vm3, %v2630_v31 }
 0x220   : > { %5362 = vmatprep.subr.msk.bf16.mxu1 %vm2232_vm5, %v4495_v40 }
 0x226   : > { %4946 = vmatmul.mubr.msk.bf16.gmra.mrb[0].mxu1 %vm2219_vm3, %v2631_v35 }
 0x227   : > { %4951 = vmatprep.mubr.msk.bf16.mxu1 %vm2219_vm3, %v2730_v36 }
 0x22e   : > { %4952 = vmatmul.mubr.msk.bf16.vlgmr.msra.gmra.mrb[4].mxu1 %vm2219_vm3, %v2731_v41 }
 0x22f   : > { %4960 = vmatpush3.bf16.msra.mxu1 %v2851_v42  ;;  %4955 = vmatprep.mubr.msk.bf16.mxu1 %vm2219_vm3, %v2732_v43 }
 0x230   : > { %5363 = vmatprep.subr.msk.bf16.mxu1 %vm2232_vm5, %v4500_v44 }
 0x236   : > { %4956 = vmatmul.mubr.msk.bf16.gmra.mrb[0].mxu1 %vm2219_vm3, %v2733_v46 }
 0x237   : > { %4961 = vmatprep.mubr.msk.bf16.mxu1 %vm2219_vm3, %v2832_v47 }
 0x23e   : > { %4962 = vmatmul.mubr.msk.bf16.vlgmr.msra.gmra.mrb[4].mxu1 %vm2219_vm3, %v2833_v48 }
 0x23f   : > { %4970 = vmatpush3.bf16.msra.mxu1 %v2954_v50  ;;  %4965 = vmatprep.mubr.msk.bf16.mxu1 %vm2219_vm3, %v2834_v51 }
 0x240   : > { %5364 = vmatprep.subr.msk.bf16.mxu1 %vm2232_vm5, %v4505_v52 }
 0x246   : > { %4966 = vmatmul.mubr.msk.bf16.gmra.mrb[0].mxu1 %vm2219_vm3, %v2835_v54 }
 0x247   : > { %4971 = vmatprep.mubr.msk.bf16.mxu1 %vm2219_vm3, %v5952_v5 }
 0x24e   : > { %4972 = vmatmul.mubr.msk.bf16.vlgmr.msra.gmra.mrb[4].mxu1 %vm2219_vm3, %v5955_v19  ;;  %v3320_v19 = vsel %vm2232_vm5, %v4516_v7, 0 }
 0x24f   : > { %4980 = vmatpush3.bf16.msra.mxu1 %v3056_v60  ;;  %4975 = vmatprep.mubr.msk.bf16.mxu1 %vm2219_vm3, %v5967_v12 }
 0x250   : > { %5365 = vmatprep.subr.msk.bf16.mxu1 %vm2232_vm5, %v4510_v61 }
 0x256   : > { %4976 = vmatmul.mubr.msk.bf16.gmra.mrb[0].mxu1 %vm2219_vm3, %v2938_v49 }
 0x257   : > { %4981 = vmatprep.mubr.msk.bf16.mxu1 %vm2219_vm3, %v5940_v8 }
 0x25e   : > { %4982 = vmatmul.mubr.msk.bf16.vlgmr.msra.gmra.mrb[4].mxu1 %vm2219_vm3, %v5919_v63  ;;  %v3142_v63 = vpack.c.bf16 %v6052_v0, %v2831_v53 }
 0x25f   : > { %4990 = vmatpush3.bf16.msra.mxu1 %v3158_v55  ;;  %4985 = vmatprep.mubr.msk.bf16.mxu1 %vm2219_vm3, %v5933_v2 }
 0x260   : > { %5366 = vmatprep.subr.msk.bf16.mxu1 %vm2232_vm5, %v4516_v7 }
 0x266   : > { %4986 = vmatmul.mubr.msk.bf16.gmra.mrb[0].mxu1 %vm2219_vm3, %v3040_v59 }
 0x267   : > { %4991 = vmatprep.mubr.msk.bf16.mxu1 %vm2219_vm3, %v5973_v25 }
 0x26e   : > { %4992 = vmatmul.mubr.msk.bf16.vlgmr.msra.gmra.mrb[4].mxu1 %vm2219_vm3, %v5976_v29 }
 0x26f   : > { %4995 = vmatprep.mubr.msk.bf16.mxu1 %vm2219_vm3, %v2529_v37  ;;  %5000 = vmatpush3.bf16.msra.mxu1 %v3320_v19 }
 0x270   : > { %5367 = vmatprep.subr.msk.bf16.mxu1 %vm2232_vm5, %v3292_v20 }
 0x276   : > { %4996 = vmatmul.mubr.msk.bf16.gmra.mrb[0].mxu1 %vm2219_vm3, %v3142_v63  ;;  %v3400_v63 = vsel %vm2232_vm5, %v3292_v20, 0 }
 0x2ba   : > { %v6056_v1 = vpop.f32.mrb[8].mxu0 }
 0x2bb   : > { %v6058_v2 = vpop.f32.mrb[9].mxu0 }
 0x2bc   : > { %v6060_v4 = vpop.f32.mrb[10].mxu0 }
 0x2bd   : > { %v6062_v6 = vpop.f32.mrb[11].mxu0 }
 0x2c2   : > { %v6064_v8 = vpop.f32.mrb[12].mxu0 }
 0x2c3   : > { %v6066_v3 = vpop.f32.mrb[13].mxu0 }
 0x2c4   : > { %v6068_v9 = vpop.f32.mrb[14].mxu0 }
 0x2c5   : > { %v6070_v11 = vpop.f32.mrb[15].mxu0 }
 0x2ca   : > { %v4913_v13 = vpop.f32.mrb[16].mxu0 }
 0x2cb   : > { %v2407_v15 = vpop.f32.mrb[17].mxu0 }
 0x2cc   : > { %v4914_v5 = vpop.f32.mrb[18].mxu0 }
 0x2cd   : > { %v2410_v16 = vpop.f32.mrb[19].mxu0 }
 0x341   : > { %v4993_v21 = vpop.f32.mrb[4].mxu1 }
 0x342   : > { %v5091_v10 = vadd.f32 %v4993_v21, %v4913_v13  ;;  %v3194_v12 = vpop.f32.mrb[5].mxu1  ;;  %v4525_v13 = vld [vmem:[%s6275_s5 + $0x8] sm:$0xf] }
 0x343   : > { %v5092_v24 = vadd.f32 %v3194_v12, %v2407_v15  ;;  %v4994_v14 = vpop.f32.mrb[6].mxu1 }
 0x344   : > { %v3242_v17 = vadd.f32 %v5091_v10, %v4515_v23  ;;  %v5093_v18 = vadd.f32 %v4994_v14, %v4914_v5  ;;  %v3197_v25 = vpop.f32.mrb[7].mxu1  ;;  %v3494_v14 = vsel %vm2232_vm5, %v4525_v13, 0 }
 0x345   : > { %v3240_v27 = vadd.f32 %v5092_v24, %v4515_v23  ;;  %v5094_v28 = vadd.f32 %v3197_v25, %v2410_v16  ;;  %v4530_v25 = vld [vmem:[%s6275_s5 + $0xc] sm:$0xf] }
 0x346   : > { %vm3250_vm6 = vcmp.gt.f32.partialorder %v3242_v17, 0.0  ;;  %v3258_v29 = vmul.f32 0.01, %v3242_v17  ;;  %v3243_v30 = vadd.f32 %v5093_v18, %v4515_v23 }
 0x347   : > { %vm3248_vm7 = vcmp.gt.f32.partialorder %v3240_v27, 0.0  ;;  %v3256_v33 = vmul.f32 0.01, %v3240_v27  ;;  %v3241_v34 = vadd.f32 %v5094_v28, %v4515_v23 }
 0x348   : > { %v3266_v37 = vsel %vm3250_vm6, %v3242_v17, %v3258_v29  ;;  %vm3251_vm8 = vcmp.gt.f32.partialorder %v3243_v30, 0.0  ;;  %v3259_v38 = vmul.f32 0.01, %v3243_v30 }
 0x349   : > { %3274 = vst.msk [vmem:[#allocation2 + $0x31] sm:$0xff] %vm2219_vm3, %v3266_v37  ;;  %v3264_v39 = vsel %vm3248_vm7, %v3240_v27, %v3256_v33  ;;  %vm3249_vm9 = vcmp.gt.f32.partialorder %v3241_v34, 0.0  ;;  %v3257_v26 = vmul.f32 0.01, %v3241_v34  ;;  %v4997_v31 = vpop.f32.mrb[0].mxu1 }
 0x34a   : > { %3272 = vst.msk [vmem:[#allocation2 + $0x11] sm:$0xff] %vm2219_vm3, %v3264_v39  ;;  %v3267_v40 = vsel %vm3251_vm8, %v3243_v30, %v3259_v38  ;;  %v3246_v32 = vadd.f32 %v4997_v31, %v4515_v23  ;;  %v3210_v35 = vpop.f32.mrb[1].mxu1  ;;  %v3596_v39 = vsel %vm2232_vm5, %v4530_v25, 0 }
 0x34b   : > { %3275 = vst.msk [vmem:[#allocation2 + $0x41] sm:$0xff] %vm2219_vm3, %v3267_v40  ;;  %v3265_v36 = vsel %vm3249_vm9, %v3241_v34, %v3257_v26  ;;  %v3244_v41 = vadd.f32 %v4515_v23, %v3210_v35  ;;  %v4998_v42 = vpop.f32.mrb[2].mxu1  ;;  %v4535_v40 = vld [vmem:[%s6275_s5 + $0x10] sm:$0xf] }
 0x34c   : > { %3273 = vst.msk [vmem:[#allocation2 + $0x21] sm:$0xff] %vm2219_vm3, %v3265_v36  ;;  %vm3254_vm10 = vcmp.gt.f32.partialorder %v3246_v32, 0.0  ;;  %v3262_v43 = vmul.f32 0.01, %v3246_v32  ;;  %v3247_v44 = vadd.f32 %v4998_v42, %v4515_v23  ;;  %v3213_v45 = vpop.f32.mrb[3].mxu1  ;;  %v3698_v42 = vsel %vm2232_vm5, %v4535_v40, 0 }
 0x34d   : > { %vm3252_vm11 = vcmp.gt.f32.partialorder %v3244_v41, 0.0  ;;  %v3260_v46 = vmul.f32 0.01, %v3244_v41  ;;  %v3245_v47 = vadd.f32 %v4515_v23, %v3213_v45 }
 0x34e   : > { %v3270_v48 = vsel %vm3254_vm10, %v3246_v32, %v3262_v43  ;;  %vm3255_vm12 = vcmp.gt.f32.partialorder %v3247_v44, 0.0  ;;  %v3263_v50 = vmul.f32 0.01, %v3247_v44 }
 0x34f   : > { %3278 = vst.msk [vmem:[#allocation2 + $0x71] sm:$0xff] %vm2219_vm3, %v3270_v48  ;;  %v3268_v51 = vsel %vm3252_vm11, %v3244_v41, %v3260_v46  ;;  %vm3253_vm13 = vcmp.gt.f32.partialorder %v3245_v47, 0.0  ;;  %v3261_v52 = vmul.f32 0.01, %v3245_v47 }
 0x350   : > { %3276 = vst.msk [vmem:[#allocation2 + $0x51] sm:$0xff] %vm2219_vm3, %v3268_v51  ;;  %v3271_v53 = vsel %vm3255_vm12, %v3247_v44, %v3263_v50  ;;  %v6098_v55 = vld [vmem:[#allocation2 + $0x31] sm:$0xff] }
 0x351   : > { %3279 = vst.msk [vmem:[#allocation2 + $0x81] sm:$0xff] %vm2219_vm3, %v3271_v53  ;;  %v3269_v54 = vsel %vm3253_vm13, %v3245_v47, %v3261_v52  ;;  %v6091_v60 = vld [vmem:[#allocation2 + $0x11] sm:$0xff] }
 0x352   : > { %3277 = vst.msk [vmem:[#allocation2 + $0x61] sm:$0xff] %vm2219_vm3, %v3269_v54  ;;  %v3301_v61 = vpack.c.bf16 %v6091_v60, %v5903_v57  ;;  %v6111_v57 = vld [vmem:[#allocation2 + $0x41] sm:$0xff]  ;;  %v3281_v16 = vld [vmem:[#allocation2 + $0x10] sm:$0xff]  ;;  %v4545_v52 = vld [vmem:[%s6275_s5 + $0x18] sm:$0xf] }
 0x353   : > { %v6096_v49 = vld [vmem:[#allocation2 + $0x21] sm:$0xff]  ;;  %v3288_v21 = vpack.c.bf16 %v3281_v16, %v5923_v58  ;;  %v3283_v12 = vld [vmem:[#allocation2 + $0x30] sm:$0xff]  ;;  %v3680_v48 = vpack.c.bf16 %v6111_v57, %v6098_v55 }
 0x354   : > { %5001 = vmatprep.mubr.msk.bf16.mxu1 %vm2219_vm3, %v3301_v61  ;;  %v6103_v59 = vpack.c.bf16 %v6098_v55, %v6096_v49  ;;  %v3282_v23 = vld [vmem:[#allocation2 + $0x20] sm:$0xff]  ;;  %v3468_v27 = vld [vmem:[#allocation2 + $0x12] sm:$0xff]  ;;  %v3679_v47 = vpack.c.bf16 %v6096_v49, %v6091_v60  ;;  %v3902_v49 = vsel %vm2232_vm5, %v4545_v52, 0 }
 0x355   : > { %v6134_v24 = vpack.c.bf16 %v3283_v12, %v3282_v23  ;;  %v3284_v17 = vld [vmem:[#allocation2 + $0x40] sm:$0xff]  ;;  %v3475_v30 = vpack.c.bf16 %v3468_v27, %v5965_v22  ;;  %v3470_v37 = vld [vmem:[#allocation2 + $0x32] sm:$0xff]  ;;  %v3577_v36 = vpack.c.bf16 %v3282_v23, %v3281_v16 }
 0x356   : > { %5002 = vmatmul.mubr.msk.bf16.vlgmr.msra.gmra.mrb[8].mxu1 %vm2219_vm3, %v6103_v59  ;;  %v6124_v19 = vld [vmem:[#allocation2 + $0x71] sm:$0xff]  ;;  %v3469_v33 = vld [vmem:[#allocation2 + $0x22] sm:$0xff]  ;;  %v3578_v41 = vpack.c.bf16 %v3284_v17, %v3283_v12 }
 0x357   : > { %5010 = vmatpush3.bf16.msra.mxu1 %v3400_v63  ;;  %v6113_v15 = vld [vmem:[#allocation2 + $0x51] sm:$0xff]  ;;  %v6153_v38 = vpack.c.bf16 %v3470_v37, %v3469_v33  ;;  %v3471_v26 = vld [vmem:[#allocation2 + $0x42] sm:$0xff]  ;;  %v3781_v60 = vpack.c.bf16 %v3469_v33, %v3468_v27  ;;  %v4550_v63 = vld [vmem:[%s6275_s5 + $0x1c] sm:$0xf] }
 0x358   : > { %v6117_v5 = vpack.c.bf16 %v6113_v15, %v6111_v57  ;;  %5368 = vmatprep.subr.msk.bf16.mxu1 %vm2232_vm5, %v4525_v13  ;;  %v3285_v10 = vld [vmem:[#allocation2 + $0x50] sm:$0xff]  ;;  %v3576_v45 = vld [vmem:[#allocation2 + $0x80] sm:$0xff]  ;;  %v3782_v61 = vpack.c.bf16 %v3471_v26, %v3470_v37 }
 0x359   : > { %v6120_v7 = vld [vmem:[#allocation2 + $0x61] sm:$0xff]  ;;  %v6137_v18 = vpack.c.bf16 %v3285_v10, %v3284_v17  ;;  %v3287_v28 = vld [vmem:[#allocation2 + $0x70] sm:$0xff]  ;;  %v3886_v16 = vpack.c.bf16 %v6032_v62, %v3576_v45 }
 0x35a   : > { %5005 = vmatprep.mubr.msk.bf16.mxu1 %vm2219_vm3, %v6117_v5  ;;  %v6128_v20 = vpack.c.bf16 %v6124_v19, %v6120_v7  ;;  %v3286_v58 = vld [vmem:[#allocation2 + $0x60] sm:$0xff]  ;;  %v3472_v34 = vld [vmem:[#allocation2 + $0x52] sm:$0xff]  ;;  %v3580_v46 = vpack.c.bf16 %v3576_v45, %v3287_v28  ;;  %v3681_v51 = vpack.c.bf16 %v6120_v7, %v6113_v15  ;;  %v4004_v15 = vsel %vm2232_vm5, %v4550_v63, 0 }
 0x35b   : > { %v6147_v29 = vpack.c.bf16 %v3287_v28, %v3286_v58  ;;  %v6156_v31 = vpack.c.bf16 %v3472_v34, %v3471_v26  ;;  %v3473_v22 = vld [vmem:[#allocation2 + $0x62] sm:$0xff]  ;;  %v3474_v32 = vld [vmem:[#allocation2 + $0x72] sm:$0xff]  ;;  %v3579_v43 = vpack.c.bf16 %v3286_v58, %v3285_v10 }
 0x35c   : > { %v3478_v35 = vpack.c.bf16 %v3474_v32, %v3473_v22  ;;  %v4540_v44 = vld [vmem:[%s6275_s5 + $0x14] sm:$0xf]  ;;  %v3678_v53 = vld [vmem:[#allocation2 + $0x81] sm:$0xff]  ;;  %v3783_v55 = vpack.c.bf16 %v3473_v22, %v3472_v34 }
 0x35d   : > { %v3800_v50 = vsel %vm2232_vm5, %v4540_v44, 0  ;;  %v3682_v54 = vpack.c.bf16 %v3678_v53, %v6124_v19  ;;  %v3780_v13 = vld [vmem:[#allocation2 + $0x82] sm:$0xff] }
 0x35e   : > { %5006 = vmatmul.mubr.msk.bf16.gmra.mrb[12].mxu1 %vm2219_vm3, %v6128_v20  ;;  %v3784_v57 = vpack.c.bf16 %v3780_v13, %v3474_v32  ;;  %v4555_v7 = vld [vmem:[%s6275_s5 + $0x20] sm:$0xf]  ;;  %v4090_v62 = vpack.c.bf16 %v6052_v0, %v3780_v13 }
 0x35f   : > { %5011 = vmatprep.mubr.msk.bf16.mxu1 %vm2219_vm3, %v3288_v21  ;;  %v4106_v19 = vsel %vm2232_vm5, %v4555_v7, 0  ;;  %v3988_v21 = vpack.c.bf16 %v6043_v56, %v3678_v53  ;;  %v4560_v56 = vld [vmem:[%s6276_s6] ss:$0 sm:$0xff] }
 0x366   : > { %5012 = vmatmul.mubr.msk.bf16.vlgmr.msra.gmra.mrb[8].mxu1 %vm2219_vm3, %v6134_v24 }
 0x367   : > { %5020 = vmatpush3.bf16.msra.mxu1 %v3494_v14  ;;  %5015 = vmatprep.mubr.msk.bf16.mxu1 %vm2219_vm3, %v6137_v18 }
 0x368   : > { %5369 = vmatprep.subr.msk.bf16.mxu1 %vm2232_vm5, %v4530_v25 }
 0x36e   : > { %5016 = vmatmul.mubr.msk.bf16.gmra.mrb[12].mxu1 %vm2219_vm3, %v6147_v29 }
 0x36f   : > { %5021 = vmatprep.mubr.msk.bf16.mxu1 %vm2219_vm3, %v3475_v30 }
 0x376   : > { %5022 = vmatmul.mubr.msk.bf16.vlgmr.msra.gmra.mrb[8].mxu1 %vm2219_vm3, %v6153_v38 }
 0x377   : > { %5030 = vmatpush3.bf16.msra.mxu1 %v3596_v39  ;;  %5025 = vmatprep.mubr.msk.bf16.mxu1 %vm2219_vm3, %v6156_v31 }
 0x378   : > { %5370 = vmatprep.subr.msk.bf16.mxu1 %vm2232_vm5, %v4535_v40 }
 0x37e   : > { %5026 = vmatmul.mubr.msk.bf16.gmra.mrb[12].mxu1 %vm2219_vm3, %v3478_v35 }
 0x37f   : > { %5031 = vmatprep.mubr.msk.bf16.mxu1 %vm2219_vm3, %v3577_v36 }
 0x386   : > { %5032 = vmatmul.mubr.msk.bf16.vlgmr.msra.gmra.mrb[8].mxu1 %vm2219_vm3, %v3578_v41 }
 0x387   : > { %5040 = vmatpush3.bf16.msra.mxu1 %v3698_v42  ;;  %5035 = vmatprep.mubr.msk.bf16.mxu1 %vm2219_vm3, %v3579_v43 }
 0x388   : > { %5371 = vmatprep.subr.msk.bf16.mxu1 %vm2232_vm5, %v4540_v44 }
 0x38e   : > { %5036 = vmatmul.mubr.msk.bf16.gmra.mrb[12].mxu1 %vm2219_vm3, %v3580_v46 }
 0x38f   : > { %5041 = vmatprep.mubr.msk.bf16.mxu1 %vm2219_vm3, %v3679_v47 }
 0x396   : > { %5042 = vmatmul.mubr.msk.bf16.vlgmr.msra.gmra.mrb[8].mxu1 %vm2219_vm3, %v3680_v48 }
 0x397   : > { %5050 = vmatpush3.bf16.msra.mxu1 %v3800_v50  ;;  %5045 = vmatprep.mubr.msk.bf16.mxu1 %vm2219_vm3, %v3681_v51 }
 0x398   : > { %5372 = vmatprep.subr.msk.bf16.mxu1 %vm2232_vm5, %v4545_v52 }
 0x39e   : > { %5046 = vmatmul.mubr.msk.bf16.gmra.mrb[12].mxu1 %vm2219_vm3, %v3682_v54 }
 0x39f   : > { %5051 = vmatprep.mubr.msk.bf16.mxu1 %vm2219_vm3, %v3781_v60 }
 0x3a6   : > { %5052 = vmatmul.mubr.msk.bf16.vlgmr.msra.gmra.mrb[8].mxu1 %vm2219_vm3, %v3782_v61 }
 0x3a7   : > { %5060 = vmatpush3.bf16.msra.mxu1 %v3902_v49  ;;  %5055 = vmatprep.mubr.msk.bf16.mxu1 %vm2219_vm3, %v3783_v55 }
 0x3a8   : > { %5373 = vmatprep.subr.msk.bf16.mxu1 %vm2232_vm5, %v4550_v63 }
 0x3ae   : > { %5056 = vmatmul.mubr.msk.bf16.gmra.mrb[12].mxu1 %vm2219_vm3, %v3784_v57 }
 0x3af   : > { %5061 = vmatprep.mubr.msk.bf16.mxu1 %vm2219_vm3, %v6134_v24 }
 0x3b6   : > { %5062 = vmatmul.mubr.msk.bf16.vlgmr.msra.gmra.mrb[8].mxu1 %vm2219_vm3, %v6137_v18 }
 0x3b7   : > { %5070 = vmatpush3.bf16.msra.mxu1 %v4004_v15  ;;  %5065 = vmatprep.mubr.msk.bf16.mxu1 %vm2219_vm3, %v6147_v29 }
 0x3b8   : > { %5374 = vmatprep.subr.msk.bf16.mxu1 %vm2232_vm5, %v4555_v7 }
 0x3be   : > { %5066 = vmatmul.mubr.msk.bf16.gmra.mrb[12].mxu1 %vm2219_vm3, %v3886_v16 }
 0x3bf   : > { %5071 = vmatprep.mubr.msk.bf16.mxu1 %vm2219_vm3, %v6103_v59  ;;  %v4466_v59 = vld [vmem:[%s6278_s8] ss:$0 sm:$0xff] }
 0x3c0   : > { %v2279_v0 = vadd.f32 %v6056_v1, %v4466_v59  ;;  %v2271_v18 = vadd.f32 %v4466_v59, %v6058_v2  ;;  %v2282_v27 = vadd.f32 %v6060_v4, %v4466_v59  ;;  %v2274_v33 = vadd.f32 %v4466_v59, %v6062_v6 }
 0x3c1   : > { %v2287_v42 = vadd.f32 %v4466_v59, %v6066_v3  ;;  %v2298_v45 = vadd.f32 %v6068_v9, %v4466_v59  ;;  %v2290_v51 = vadd.f32 %v4466_v59, %v6070_v11 }
 0x3c6   : > { %5072 = vmatmul.mubr.msk.bf16.vlgmr.msra.gmra.mrb[8].mxu1 %vm2219_vm3, %v6117_v5 }
 0x3c7   : > { %5080 = vmatpush3.bf16.msra.mxu1 %v4106_v19  ;;  %5075 = vmatprep.mubr.msk.bf16.mxu1 %vm2219_vm3, %v6128_v20 }
 0x3ce   : > { %5076 = vmatmul.mubr.msk.bf16.gmra.mrb[12].mxu1 %vm2219_vm3, %v3988_v21 }
 0x3cf   : > { %5081 = vmatprep.mubr.msk.bf16.mxu1 %vm2219_vm3, %v6153_v38 }
 0x3d6   : > { %5082 = vmatmul.mubr.msk.bf16.vlgmr.msra.gmra.mrb[8].mxu1 %vm2219_vm3, %v6156_v31 }
 0x3d7   : > { %5085 = vmatprep.mubr.msk.bf16.mxu1 %vm2219_vm3, %v3478_v35  ;;  %v2295_v35 = vadd.f32 %v6064_v8, %v4466_v59 }
 0x3de   : > { %5086 = vmatmul.mubr.msk.bf16.gmra.mrb[12].mxu1 %vm2219_vm3, %v4090_v62 }
 0x4a9   : > { %v5083_v5 = vpop.f32.mrb[8].mxu1 }
 0x4aa   : > { %v4190_v20 = vadd.f32 %v5083_v5, %v4560_v56  ;;  %v4142_v23 = vpop.f32.mrb[9].mxu1 }
 0x4ab   : > { %v4188_v10 = vadd.f32 %v4560_v56, %v4142_v23  ;;  %v5084_v12 = vpop.f32.mrb[10].mxu1 }
 0x4ac   : > { %vm4198_vm14 = vcmp.gt.f32.partialorder %v4190_v20, 0.0  ;;  %v4206_v24 = vmul.f32 0.01, %v4190_v20  ;;  %v4191_v14 = vadd.f32 %v5084_v12, %v4560_v56  ;;  %v4145_v17 = vpop.f32.mrb[11].mxu1 }
 0x4ad   : > { %vm4196_vm15 = vcmp.gt.f32.partialorder %v4188_v10, 0.0  ;;  %v4204_v25 = vmul.f32 0.01, %v4188_v10  ;;  %v4189_v58 = vadd.f32 %v4560_v56, %v4145_v17 }
 0x4ae   : > { %v4214_v28 = vsel %vm4198_vm14, %v4190_v20, %v4206_v24  ;;  %vm4199_vm0 = vcmp.gt.f32.partialorder %v4191_v14, 0.0  ;;  %v4207_v1 = vmul.f32 0.01, %v4191_v14 }
 0x4af   : > { %v4222_v29 = vadd.f32 %v4214_v28, %v2279_v0  ;;  %v4212_v30 = vsel %vm4196_vm15, %v4188_v10, %v4204_v25  ;;  %vm4197_vm1 = vcmp.gt.f32.partialorder %v4189_v58, 0.0  ;;  %v4205_v2 = vmul.f32 0.01, %v4189_v58 }
 0x4b0   : > { %v4220_v34 = vadd.f32 %v4212_v30, %v2271_v18  ;;  %v4215_v4 = vsel %vm4199_vm0, %v4191_v14, %v4207_v1 }
 0x4b1   : > { %4230 = vst.msk [vmem:[%s6244_s22 + $0x10] sm:$0xff] %vm2219_vm3, %v4222_v29  ;;  %v4223_v37 = vadd.f32 %v4215_v4, %v2282_v27  ;;  %v4213_v38 = vsel %vm4197_vm1, %v4189_v58, %v4205_v2  ;;  %v5087_v39 = vpop.f32.mrb[12].mxu1 }
 0x4b2   : > { %4228 = vst.msk [vmem:[%s6244_s22] sm:$0xff] %vm2219_vm3, %v4220_v34  ;;  %v4221_v26 = vadd.f32 %v4213_v38, %v2274_v33  ;;  %v4194_v31 = vadd.f32 %v5087_v39, %v4560_v56  ;;  %v4158_v40 = vpop.f32.mrb[13].mxu1 }
 0x4b3   : > { %4231 = vst.msk [vmem:[%s6244_s22 + $0x18] sm:$0xff] %vm2219_vm3, %v4223_v37  ;;  %v4192_v22 = vadd.f32 %v4560_v56, %v4158_v40  ;;  %v5088_v32 = vpop.f32.mrb[14].mxu1 }
 0x4b4   : > { %4229 = vst.msk [vmem:[%s6244_s22 + $0x8] sm:$0xff] %vm2219_vm3, %v4221_v26  ;;  %vm4202_vm2 = vcmp.gt.f32.partialorder %v4194_v31, 0.0  ;;  %v4210_v6 = vmul.f32 0.01, %v4194_v31  ;;  %v4195_v36 = vadd.f32 %v5088_v32, %v4560_v56  ;;  %v4161_v41 = vpop.f32.mrb[15].mxu1 }
 0x4b5   : > { %vm4200_vm4 = vcmp.gt.f32.partialorder %v4192_v22, 0.0  ;;  %v4208_v43 = vmul.f32 0.01, %v4192_v22  ;;  %v4193_v44 = vadd.f32 %v4560_v56, %v4161_v41 }
 0x4b6   : > { %v4218_v46 = vsel %vm4202_vm2, %v4194_v31, %v4210_v6  ;;  %vm4203_vm5 = vcmp.gt.f32.partialorder %v4195_v36, 0.0  ;;  %v4211_v8 = vmul.f32 0.01, %v4195_v36 }
 0x4b7   : > { %v4226_v47 = vadd.f32 %v4218_v46, %v2295_v35  ;;  %v4216_v48 = vsel %vm4200_vm4, %v4192_v22, %v4208_v43  ;;  %vm4201_vm6 = vcmp.gt.f32.partialorder %v4193_v44, 0.0  ;;  %v4209_v50 = vmul.f32 0.01, %v4193_v44 }
 0x4b8   : > { %v4224_v52 = vadd.f32 %v4216_v48, %v2287_v42  ;;  %v4219_v53 = vsel %vm4203_vm5, %v4195_v36, %v4211_v8 }
 0x4b9   : > { %4234 = vst.msk [vmem:[%s6244_s22 + $0x30] sm:$0xff] %vm2219_vm3, %v4226_v47  ;;  %v4227_v3 = vadd.f32 %v4219_v53, %v2298_v45  ;;  %v4217_v54 = vsel %vm4201_vm6, %v4193_v44, %v4209_v50 }
 0x4ba   : > { %4232 = vst.msk [vmem:[%s6244_s22 + $0x20] sm:$0xff] %vm2219_vm3, %v4224_v52  ;;  %v4225_v9 = vadd.f32 %v4217_v54, %v2290_v51 }
 0x4bb   : > { %4235 = vst.msk [vmem:[%s6244_s22 + $0x38] sm:$0xff] %vm2219_vm3, %v4227_v3 }
 0x4bc   : > { %4233 = vst.msk [vmem:[%s6244_s22 + $0x28] sm:$0xff] %vm2219_vm3, %v4225_v9 }
 0x4bd PF: > { %s19_s30 = sadd.s32 1, %s5423_s30  }
 0x4be   : > { %p16_p5 = scmp.ge.s32.totalorder %s19_s30, 4  }
 0x4c0   :  { %18 = sbr.rel (!%p16_p5) target bundleno = 1 (0x1), region = 122 }

</bundles_post_ra>
